<compile_context>
chip_gen: v7x
topology: tpu7x:2x2x1
jax: 0.10.0
libtpu: 0.0.40
codegen_flags: <defaults>
</compile_context>

<pallas_src>
import functools

import jax
import jax.numpy as jnp
from jax.experimental import pallas as pl
from jax.experimental.pallas import tpu as pltpu


def _round_up(x, m):
    return ((x + m - 1) // m) * m


# ------------------------------------------------------------------- kernel -

def lstm_fused_kernel(x_ref, wih_ref, b_ref, whh_ref, wfc_ref, bfc_ref,
                      out_ref, h_ref, c_ref, xs_ref, xg_ref,
                      *, hidden_pad, chunk, n_chunks, last_valid, compute_dtype):
    """One grid step == one chunk of `chunk` timesteps for one batch block.

    Grid = (batch_blocks ["parallel"], time_chunks ["arbitrary"]).
    h/c persist in VMEM scratch across the time axis; all weights stay resident.
    """
    t = pl.program_id(1)
    Hp = hidden_pad
    Bb = x_ref.shape[0]          # real batch rows in this block
    Bp = h_ref.shape[0]          # 8-aligned batch rows used inside the kernel

    @pl.when(t == 0)
    def _():
        h_ref[...] = jnp.zeros_like(h_ref)
        c_ref[...] = jnp.zeros_like(c_ref)
        xs_ref[...] = jnp.zeros_like(xs_ref)   # keep padded batch rows deterministic

    def process(nsteps):
        # ---- hoisted input projection for the whole chunk (off the serial path) ----
        # Stage the chunk time-major with static copies, then ONE MXU matmul produces
        # every timestep's gate pre-activation; it never touches HBM again.
        for j in range(nsteps):                                   # static, unrolled
            xs_ref[j * Bp:j * Bp + Bb, :] = x_ref[:, j, :]
        x_tm = xs_ref[:nsteps * Bp, :].astype(compute_dtype)      # (nsteps*Bp, I)
        xg = (jnp.dot(x_tm, wih_ref[...], preferred_element_type=jnp.float32)
              + b_ref[...])                                        # (nsteps*Bp, 4Hp) f32
        xg_ref[:nsteps * Bp, :] = xg

        # ---- serial recurrence: only h @ W_hh^T + gate math on the critical path ----
        def step(j, carry):
            h, c = carry
            row = pl.multiple_of(j * Bp, Bp)                      # 8-aligned sublane start
            gates = (xg_ref[pl.ds(row, Bp), :]
                     + jnp.dot(h, whh_ref[...], preferred_element_type=jnp.float32))
            # Gate slices sit at 128-aligned offsets (Hp % 128 == 0): tile aligned.
            i_g = jax.nn.sigmoid(gates[:, 0 * Hp:1 * Hp])
            f_g = jax.nn.sigmoid(gates[:, 1 * Hp:2 * Hp])
            g_g = jnp.tanh(gates[:, 2 * Hp:3 * Hp])
            o_g = jax.nn.sigmoid(gates[:, 3 * Hp:4 * Hp])
            c_new = f_g * c + i_g * g_g
            h_new = (o_g * jnp.tanh(c_new)).astype(compute_dtype)
            return h_new, c_new

        h_fin, c_fin = jax.lax.fori_loop(0, nsteps, step,
                                         (h_ref[...], c_ref[...]), unroll=True)
        h_ref[...] = h_fin
        c_ref[...] = c_fin

    if last_valid == chunk:            # every chunk is full: single unmasked path
        process(chunk)
    else:                              # static tail: no per-step masking anywhere
        @pl.when(t < n_chunks - 1)
        def _():
            process(chunk)

        @pl.when(t == n_chunks - 1)
        def _():
            process(last_valid)

    # ---- fused FC head on the final cell state (PyTorch: fc(h[-1]) == fc(c_n)) ----
    @pl.when(t == n_chunks - 1)
    def _():
        res = (jnp.dot(c_ref[...].astype(compute_dtype), wfc_ref[...],
                       preferred_element_type=jnp.float32) + bfc_ref[...])
        out_ref[...] = res[:Bb, :].astype(out_ref.dtype)


# ------------------------------------------------------- parameter prep (1x) -

def prepare_params(params, *, compute_dtype=jnp.float32):
    """One-time repack of PyTorch-layout weights into the kernel's gate-blocked,
    lane-padded layout (hoisted out of the per-step forward path).
    compute_dtype=bfloat16 is valid on v5e/v6e/v7x (MXU operands only; gate math
    and the cell state stay f32)."""
    H = params["w_hh"].shape[1]
    I = params["w_ih"].shape[1]
    O = params["w_fc"].shape[0]
    LANE = 128
    Hp = _round_up(H, LANE)
    Op = _round_up(O, LANE)

    # PyTorch gate order [i, f, g, o]; gate k occupies columns [k*Hp, (k+1)*Hp).
    w_ih_g = params["w_ih"].reshape(4, H, I)
    w_hh_g = params["w_hh"].reshape(4, H, H)
    b_g = (params["b_ih"] + params["b_hh"]).reshape(4, H)

    wih_t = jnp.transpose(jnp.pad(w_ih_g, ((0, 0), (0, Hp - H), (0, 0))),
                          (2, 0, 1)).reshape(I, 4 * Hp).astype(compute_dtype)
    whh_t = jnp.transpose(jnp.pad(w_hh_g, ((0, 0), (0, Hp - H), (0, Hp - H))),
                          (2, 0, 1)).reshape(Hp, 4 * Hp).astype(compute_dtype)
    b = jnp.pad(b_g, ((0, 0), (0, Hp - H))).reshape(1, 4 * Hp).astype(jnp.float32)
    wfc_t = jnp.pad(params["w_fc"].T,
                    ((0, Hp - H), (0, Op - O))).astype(compute_dtype)
    bfc = jnp.pad(params["b_fc"], (0, Op - O))[None, :].astype(jnp.float32)

    return {"wih_t": wih_t, "whh_t": whh_t, "b": b, "wfc_t": wfc_t, "bfc": bfc,
            "sizes": (H, O, Hp, Op), "compute_dtype": compute_dtype}


# ------------------------------------------------------------------ wrapper -

def lstm_forward(x, prep, *, time_chunk=32, batch_block=None):
    """x: (B, T, I) float32 (batch_first, like the PyTorch module). Returns (1, B, O)."""
    B, T, I = x.shape
    H, O, Hp, Op = prep["sizes"]
    compute_dtype = prep["compute_dtype"]

    # Time chunking; the tail chunk is handled with a statically sized loop.
    if T <= time_chunk:
        Tc = T
    else:
        Tc = max(8, (time_chunk // 8) * 8)    # keep x's (Tc, I) block tile-legal
    n_chunks = pl.cdiv(T, Tc)
    last_valid = T - (n_chunks - 1) * Tc

    # Optional batch split across a "parallel" grid axis (v7x: 2 TensorCores).
    if batch_block is None:
        Bb, n_bblocks = B, 1
    else:
        assert B % batch_block == 0 and batch_block % 8 == 0
        Bb, n_bblocks = batch_block, B // batch_block
    Bp = _round_up(Bb, 8)                     # 8-aligned rows used inside the kernel

    kernel = functools.partial(
        lstm_fused_kernel, hidden_pad=Hp, chunk=Tc, n_chunks=n_chunks,
        last_valid=last_valid, compute_dtype=compute_dtype)

    # Explicit VMEM budget (scoped default is only 16 MiB on v5e / 32 MiB on v6e, v7x).
    csize = jnp.finfo(compute_dtype).bits // 8
    est = (2 * Bb * Tc * I * 4                                    # x chunk (dbl-buffered)
           + 2 * (I * 4 * Hp + Hp * 4 * Hp + Hp * Op) * csize     # resident weights
           + 2 * (4 * Hp + Op) * 4                                # biases
           + 2 * Bb * Op * 4                                      # output block
           + Bp * Hp * (csize + 4)                                # h + c scratch
           + Tc * Bp * (I + 4 * Hp) * 4)                          # x stage + xg scratch
    vmem_limit = int(min(64 * 1024 * 1024, max(32 * 1024 * 1024, 2 * est)))

    out = pl.pallas_call(
        kernel,
        out_shape=jax.ShapeDtypeStruct((n_bblocks * Bb, Op), jnp.float32),
        grid=(n_bblocks, n_chunks),
        in_specs=[
            pl.BlockSpec((Bb, Tc, I), lambda b, t: (b, t, 0)),     # x, native layout
            pl.BlockSpec((I, 4 * Hp), lambda b, t: (0, 0)),        # W_ih^T  (resident)
            pl.BlockSpec((1, 4 * Hp), lambda b, t: (0, 0)),        # b_ih + b_hh
            pl.BlockSpec((Hp, 4 * Hp), lambda b, t: (0, 0)),       # W_hh^T  (resident)
            pl.BlockSpec((Hp, Op), lambda b, t: (0, 0)),           # W_fc^T  (resident)
            pl.BlockSpec((1, Op), lambda b, t: (0, 0)),            # b_fc
        ],
        out_specs=pl.BlockSpec((Bb, Op), lambda b, t: (b, 0)),     # resident over t
        scratch_shapes=[
            pltpu.VMEM((Bp, Hp), compute_dtype),           # h state
            pltpu.VMEM((Bp, Hp), jnp.float32),             # c state (kept f32)
            pltpu.VMEM((Tc * Bp, I), jnp.float32),         # time-major x staging
            pltpu.VMEM((Tc * Bp, 4 * Hp), jnp.float32),    # per-chunk gate pre-acts
        ],
        compiler_params=pltpu.CompilerParams(
            dimension_semantics=("parallel", "arbitrary"),
            vmem_limit_bytes=vmem_limit),
    )(x, prep["wih_t"], prep["b"], prep["whh_t"], prep["wfc_t"], prep["bfc"])

    return out[:B, :O][None, :, :]            # (1, B, O)


# ---------------------------------------------------------------- reference -

def lstm_ref(x, params):
    """Pure-JAX reference of the same forward pass."""
    B, T, I = x.shape
    H = params["w_hh"].shape[1]
    h = jnp.zeros((B, H), jnp.float32)
    c = jnp.zeros((B, H), jnp.float32)
    for t in range(T):
        gates = (x[:, t] @ params["w_ih"].T + params["b_ih"]
                 + h @ params["w_hh"].T + params["b_hh"])
        i, f, g, o = jnp.split(gates, 4, axis=-1)
        i = jax.nn.sigmoid(i)
        f = jax.nn.sigmoid(f)
        g = jnp.tanh(g)
        o = jax.nn.sigmoid(o)
        c = f * c + i * g
        h = o * jnp.tanh(c)
    y = c @ params["w_fc"].T + params["b_fc"]
    return y[None]


def init_params(key, input_size, hidden_size, output_size):
    """Deterministic PyTorch-style uniform(-1/sqrt(H), 1/sqrt(H)) init."""
    k = 1.0 / jnp.sqrt(hidden_size)
    ks = jax.random.split(key, 6)
    u = lambda kk, shape: jax.random.uniform(kk, shape, jnp.float32, -k, k)
    return {
        "w_ih": u(ks[0], (4 * hidden_size, input_size)),
        "w_hh": u(ks[1], (4 * hidden_size, hidden_size)),
        "b_ih": u(ks[2], (4 * hidden_size,)),
        "b_hh": u(ks[3], (4 * hidden_size,)),
        "w_fc": u(ks[4], (output_size, hidden_size)),
        "b_fc": u(ks[5], (output_size,)),
    }


if __name__ == "__main__":
    key = jax.random.PRNGKey(0)

    # Config 1: single full chunk; f32 MXU operands (exact) and bf16 (loose check).
    B, T, I, H, O = 4, 8, 16, 32, 1
    kx, kp, key = jax.random.split(key, 3)
    x = jax.random.normal(kx, (B, T, I), jnp.float32)
    params = init_params(kp, I, H, O)
    y_ref = lstm_ref(x, params)

    y = lstm_forward(x, prepare_params(params, compute_dtype=jnp.float32))
    jax.block_until_ready(y)
    assert y.shape == (1, B, O), y.shape
    assert jnp.allclose(y, y_ref, atol=1e-5, rtol=1e-5), (
        f"f32 mismatch: max abs err {jnp.max(jnp.abs(y - y_ref))}")

    y_bf16 = lstm_forward(x, prepare_params(params, compute_dtype=jnp.bfloat16))
    jax.block_until_ready(y_bf16)
    assert y_bf16.shape == (1, B, O), y_bf16.shape
    assert jnp.allclose(y_bf16, y_ref, atol=5e-2, rtol=5e-2), (
        f"bf16 mismatch: max abs err {jnp.max(jnp.abs(y_bf16 - y_ref))}")

    # Config 2: several chunks with a ragged tail (exercises the pl.when tail path,
    # non-multiple-of-8 batch and non-128 hidden/output padding).
    B2, T2, I2, H2, O2 = 3, 21, 10, 20, 3
    kx2, kp2, key = jax.random.split(key, 3)
    x2 = jax.random.normal(kx2, (B2, T2, I2), jnp.float32)
    params2 = init_params(kp2, I2, H2, O2)
    y2 = lstm_forward(x2, prepare_params(params2), time_chunk=8)
    jax.block_until_ready(y2)
    y2_ref = lstm_ref(x2, params2)
    assert y2.shape == (1, B2, O2), y2.shape
    assert jnp.allclose(y2, y2_ref, atol=1e-5, rtol=1e-5), (
        f"tail-chunk mismatch: max abs err {jnp.max(jnp.abs(y2 - y2_ref))}")

    print("KERNEL_OK")
</pallas_src>

<mosaic_0001>
module attributes {stable_mosaic.version = 11 : i64} {
  func.func @lstm_fused_kernel(%arg0: i32, %arg1: i32, %arg2: memref<4x8x16xf32, #tpu.memory_space<vmem>>, %arg3: memref<16x512xf32, #tpu.memory_space<vmem>>, %arg4: memref<1x512xf32, #tpu.memory_space<vmem>>, %arg5: memref<128x512xf32, #tpu.memory_space<vmem>>, %arg6: memref<128x128xf32, #tpu.memory_space<vmem>>, %arg7: memref<1x128xf32, #tpu.memory_space<vmem>>, %arg8: memref<4x128xf32, #tpu.memory_space<vmem>>, %arg9: memref<8x128xf32, #tpu.memory_space<vmem>>, %arg10: memref<8x128xf32, #tpu.memory_space<vmem>>, %arg11: memref<64x16xf32, #tpu.memory_space<vmem>>, %arg12: memref<64x512xf32, #tpu.memory_space<vmem>>) attributes {dimension_semantics = [#tpu.dimension_semantics<parallel>, #tpu.dimension_semantics<arbitrary>], iteration_bounds = array<i64: 1, 1>, scalar_prefetch = 0 : i64, scratch_operands = 4 : i64, tpu.core_type = #tpu.core_type<tc>, window_params = [{transform_indices = @transform_0, window_bounds = array<i64: 4, 8, 16>}, {pipeline_mode = #tpu.pipeline_mode<synchronous>, transform_indices = @transform_1, window_bounds = array<i64: 16, 512>}, {pipeline_mode = #tpu.pipeline_mode<synchronous>, transform_indices = @transform_2, window_bounds = array<i64: 1, 512>}, {pipeline_mode = #tpu.pipeline_mode<synchronous>, transform_indices = @transform_3, window_bounds = array<i64: 128, 512>}, {pipeline_mode = #tpu.pipeline_mode<synchronous>, transform_indices = @transform_4, window_bounds = array<i64: 128, 128>}, {pipeline_mode = #tpu.pipeline_mode<synchronous>, transform_indices = @transform_5, window_bounds = array<i64: 1, 128>}, {transform_indices = @transform_6, window_bounds = array<i64: 4, 128>}]} {
    %c0_i32 = arith.constant 0 : i32
    %0 = arith.cmpi eq, %arg1, %c0_i32 : i32
    %1 = arith.extui %0 : i1 to i32
    %c0_i32_0 = arith.constant 0 : i32
    %2 = arith.cmpi ne, %1, %c0_i32_0 : i32
    scf.if %2 {
      %cst_109 = arith.constant 0.000000e+00 : f32
      %297 = vector.broadcast %cst_109 : f32 to vector<8x128xf32>
      %c0_110 = arith.constant 0 : index
      %c0_111 = arith.constant 0 : index
      %298 = vector.load %arg9[%c0_110, %c0_111] : memref<8x128xf32, #tpu.memory_space<vmem>>, vector<8x128xf32>
      tpu.vector_store %arg9[%c0_110, %c0_111], %297 {strides = array<i32>} : memref<8x128xf32, #tpu.memory_space<vmem>>, vector<8x128xf32>,
      %cst_112 = arith.constant 0.000000e+00 : f32
      %299 = vector.broadcast %cst_112 : f32 to vector<8x128xf32>
      %c0_113 = arith.constant 0 : index
      %c0_114 = arith.constant 0 : index
      %300 = vector.load %arg10[%c0_113, %c0_114] : memref<8x128xf32, #tpu.memory_space<vmem>>, vector<8x128xf32>
      tpu.vector_store %arg10[%c0_113, %c0_114], %299 {strides = array<i32>} : memref<8x128xf32, #tpu.memory_space<vmem>>, vector<8x128xf32>,
      %cst_115 = arith.constant 0.000000e+00 : f32
      %301 = vector.broadcast %cst_115 : f32 to vector<64x16xf32>
      %c0_116 = arith.constant 0 : index
      %c0_117 = arith.constant 0 : index
      %302 = vector.load %arg11[%c0_116, %c0_117] : memref<64x16xf32, #tpu.memory_space<vmem>>, vector<64x16xf32>
      tpu.vector_store %arg11[%c0_116, %c0_117], %301 {strides = array<i32>} : memref<64x16xf32, #tpu.memory_space<vmem>>, vector<64x16xf32>,
    } else {
    }
    %c0 = arith.constant 0 : index
    %c0_1 = arith.constant 0 : index
    %c0_2 = arith.constant 0 : index
    %3 = vector.load %arg2[%c0, %c0_1, %c0_2] : memref<4x8x16xf32, #tpu.memory_space<vmem>>, vector<4x1x16xf32>
    %4 = vector.shape_cast %3 : vector<4x1x16xf32> to vector<4x16xf32>
    %c0_3 = arith.constant 0 : index
    %c0_4 = arith.constant 0 : index
    %5 = vector.load %arg11[%c0_3, %c0_4] : memref<64x16xf32, #tpu.memory_space<vmem>>, vector<4x16xf32>
    tpu.vector_store %arg11[%c0_3, %c0_4], %4 {strides = array<i32>} : memref<64x16xf32, #tpu.memory_space<vmem>>, vector<4x16xf32>,
    %c0_5 = arith.constant 0 : index
    %c1 = arith.constant 1 : index
    %c0_6 = arith.constant 0 : index
    %6 = vector.load %arg2[%c0_5, %c1, %c0_6] : memref<4x8x16xf32, #tpu.memory_space<vmem>>, vector<4x1x16xf32>
    %7 = vector.shape_cast %6 : vector<4x1x16xf32> to vector<4x16xf32>
    %c8 = arith.constant 8 : index
    %c0_7 = arith.constant 0 : index
    %8 = vector.load %arg11[%c8, %c0_7] : memref<64x16xf32, #tpu.memory_space<vmem>>, vector<4x16xf32>
    tpu.vector_store %arg11[%c8, %c0_7], %7 {strides = array<i32>} : memref<64x16xf32, #tpu.memory_space<vmem>>, vector<4x16xf32>,
    %c0_8 = arith.constant 0 : index
    %c2 = arith.constant 2 : index
    %c0_9 = arith.constant 0 : index
    %9 = vector.load %arg2[%c0_8, %c2, %c0_9] : memref<4x8x16xf32, #tpu.memory_space<vmem>>, vector<4x1x16xf32>
    %10 = vector.shape_cast %9 : vector<4x1x16xf32> to vector<4x16xf32>
    %c16 = arith.constant 16 : index
    %c0_10 = arith.constant 0 : index
    %11 = vector.load %arg11[%c16, %c0_10] : memref<64x16xf32, #tpu.memory_space<vmem>>, vector<4x16xf32>
    tpu.vector_store %arg11[%c16, %c0_10], %10 {strides = array<i32>} : memref<64x16xf32, #tpu.memory_space<vmem>>, vector<4x16xf32>,
    %c0_11 = arith.constant 0 : index
    %c3 = arith.constant 3 : index
    %c0_12 = arith.constant 0 : index
    %12 = vector.load %arg2[%c0_11, %c3, %c0_12] : memref<4x8x16xf32, #tpu.memory_space<vmem>>, vector<4x1x16xf32>
    %13 = vector.shape_cast %12 : vector<4x1x16xf32> to vector<4x16xf32>
    %c24 = arith.constant 24 : index
    %c0_13 = arith.constant 0 : index
    %14 = vector.load %arg11[%c24, %c0_13] : memref<64x16xf32, #tpu.memory_space<vmem>>, vector<4x16xf32>
    tpu.vector_store %arg11[%c24, %c0_13], %13 {strides = array<i32>} : memref<64x16xf32, #tpu.memory_space<vmem>>, vector<4x16xf32>,
    %c0_14 = arith.constant 0 : index
    %c4 = arith.constant 4 : index
    %c0_15 = arith.constant 0 : index
    %15 = vector.load %arg2[%c0_14, %c4, %c0_15] : memref<4x8x16xf32, #tpu.memory_space<vmem>>, vector<4x1x16xf32>
    %16 = vector.shape_cast %15 : vector<4x1x16xf32> to vector<4x16xf32>
    %c32 = arith.constant 32 : index
    %c0_16 = arith.constant 0 : index
    %17 = vector.load %arg11[%c32, %c0_16] : memref<64x16xf32, #tpu.memory_space<vmem>>, vector<4x16xf32>
    tpu.vector_store %arg11[%c32, %c0_16], %16 {strides = array<i32>} : memref<64x16xf32, #tpu.memory_space<vmem>>, vector<4x16xf32>,
    %c0_17 = arith.constant 0 : index
    %c5 = arith.constant 5 : index
    %c0_18 = arith.constant 0 : index
    %18 = vector.load %arg2[%c0_17, %c5, %c0_18] : memref<4x8x16xf32, #tpu.memory_space<vmem>>, vector<4x1x16xf32>
    %19 = vector.shape_cast %18 : vector<4x1x16xf32> to vector<4x16xf32>
    %c40 = arith.constant 40 : index
    %c0_19 = arith.constant 0 : index
    %20 = vector.load %arg11[%c40, %c0_19] : memref<64x16xf32, #tpu.memory_space<vmem>>, vector<4x16xf32>
    tpu.vector_store %arg11[%c40, %c0_19], %19 {strides = array<i32>} : memref<64x16xf32, #tpu.memory_space<vmem>>, vector<4x16xf32>,
    %c0_20 = arith.constant 0 : index
    %c6 = arith.constant 6 : index
    %c0_21 = arith.constant 0 : index
    %21 = vector.load %arg2[%c0_20, %c6, %c0_21] : memref<4x8x16xf32, #tpu.memory_space<vmem>>, vector<4x1x16xf32>
    %22 = vector.shape_cast %21 : vector<4x1x16xf32> to vector<4x16xf32>
    %c48 = arith.constant 48 : index
    %c0_22 = arith.constant 0 : index
    %23 = vector.load %arg11[%c48, %c0_22] : memref<64x16xf32, #tpu.memory_space<vmem>>, vector<4x16xf32>
    tpu.vector_store %arg11[%c48, %c0_22], %22 {strides = array<i32>} : memref<64x16xf32, #tpu.memory_space<vmem>>, vector<4x16xf32>,
    %c0_23 = arith.constant 0 : index
    %c7 = arith.constant 7 : index
    %c0_24 = arith.constant 0 : index
    %24 = vector.load %arg2[%c0_23, %c7, %c0_24] : memref<4x8x16xf32, #tpu.memory_space<vmem>>, vector<4x1x16xf32>
    %25 = vector.shape_cast %24 : vector<4x1x16xf32> to vector<4x16xf32>
    %c56 = arith.constant 56 : index
    %c0_25 = arith.constant 0 : index
    %26 = vector.load %arg11[%c56, %c0_25] : memref<64x16xf32, #tpu.memory_space<vmem>>, vector<4x16xf32>
    tpu.vector_store %arg11[%c56, %c0_25], %25 {strides = array<i32>} : memref<64x16xf32, #tpu.memory_space<vmem>>, vector<4x16xf32>,
    %c0_26 = arith.constant 0 : index
    %c0_27 = arith.constant 0 : index
    %27 = vector.load %arg11[%c0_26, %c0_27] : memref<64x16xf32, #tpu.memory_space<vmem>>, vector<64x16xf32>
    %c0_28 = arith.constant 0 : index
    %c0_29 = arith.constant 0 : index
    %28 = vector.load %arg3[%c0_28, %c0_29] : memref<16x512xf32, #tpu.memory_space<vmem>>, vector<16x512xf32>
    %cst = arith.constant dense<0.000000e+00> : vector<64x512xf32>
    %29 = tpu.matmul %27, %28, %cst {dimension_numbers = #tpu.dot_dimension_numbers<[1], [0], [0], [1], [0, 0, 1, 1], [], []>} : vector<64x16xf32>, vector<16x512xf32>, vector<64x512xf32> -> vector<64x512xf32>
    %c0_30 = arith.constant 0 : index
    %c0_31 = arith.constant 0 : index
    %30 = vector.load %arg4[%c0_30, %c0_31] : memref<1x512xf32, #tpu.memory_space<vmem>>, vector<1x512xf32>
    %31 = vector.broadcast %30 : vector<1x512xf32> to vector<64x512xf32>
    %32 = arith.addf %29, %31 : vector<64x512xf32>
    %c0_32 = arith.constant 0 : index
    %c0_33 = arith.constant 0 : index
    %33 = vector.load %arg12[%c0_32, %c0_33] : memref<64x512xf32, #tpu.memory_space<vmem>>, vector<64x512xf32>
    tpu.vector_store %arg12[%c0_32, %c0_33], %32 {strides = array<i32>} : memref<64x512xf32, #tpu.memory_space<vmem>>, vector<64x512xf32>,
    %c0_34 = arith.constant 0 : index
    %c0_35 = arith.constant 0 : index
    %34 = vector.load %arg9[%c0_34, %c0_35] : memref<8x128xf32, #tpu.memory_space<vmem>>, vector<8x128xf32>
    %c0_36 = arith.constant 0 : index
    %c0_37 = arith.constant 0 : index
    %35 = vector.load %arg10[%c0_36, %c0_37] : memref<8x128xf32, #tpu.memory_space<vmem>>, vector<8x128xf32>
    %c0_i32_38 = arith.constant 0 : i32
    %c8_i32 = arith.constant 8 : i32
    %36 = arith.muli %c0_i32_38, %c8_i32 : i32
    %37 = tpu.assume_multiple %36, 8 : i32
    %38 = arith.index_cast %37 : i32 to index
    %c0_39 = arith.constant 0 : index
    %39 = vector.load %arg12[%38, %c0_39] : memref<64x512xf32, #tpu.memory_space<vmem>>, vector<8x512xf32>
    %c0_40 = arith.constant 0 : index
    %c0_41 = arith.constant 0 : index
    %40 = vector.load %arg5[%c0_40, %c0_41] : memref<128x512xf32, #tpu.memory_space<vmem>>, vector<128x512xf32>
    %cst_42 = arith.constant dense<0.000000e+00> : vector<8x512xf32>
    %41 = tpu.matmul %34, %40, %cst_42 {dimension_numbers = #tpu.dot_dimension_numbers<[1], [0], [0], [1], [0, 0, 1, 1], [], []>} : vector<8x128xf32>, vector<128x512xf32>, vector<8x512xf32> -> vector<8x512xf32>
    %42 = arith.addf %39, %41 : vector<8x512xf32>
    %43 = vector.extract_strided_slice %42 {offsets = [0, 0], sizes = [8, 128], strides = [1, 1]} : vector<8x512xf32> to vector<8x128xf32>
    %44 = arith.negf %43 : vector<8x128xf32>
    %45 = math.exp %44 : vector<8x128xf32>
    %cst_43 = arith.constant 1.000000e+00 : f32
    %46 = vector.broadcast %cst_43 : f32 to vector<8x128xf32>
    %47 = arith.addf %46, %45 : vector<8x128xf32>
    %48 = arith.divf %46, %47 : vector<8x128xf32>
    %49 = vector.extract_strided_slice %42 {offsets = [0, 128], sizes = [8, 128], strides = [1, 1]} : vector<8x512xf32> to vector<8x128xf32>
    %50 = arith.negf %49 : vector<8x128xf32>
    %51 = math.exp %50 : vector<8x128xf32>
    %cst_44 = arith.constant 1.000000e+00 : f32
    %52 = vector.broadcast %cst_44 : f32 to vector<8x128xf32>
    %53 = arith.addf %52, %51 : vector<8x128xf32>
    %54 = arith.divf %52, %53 : vector<8x128xf32>
    %55 = vector.extract_strided_slice %42 {offsets = [0, 256], sizes = [8, 128], strides = [1, 1]} : vector<8x512xf32> to vector<8x128xf32>
    %56 = math.tanh %55 : vector<8x128xf32>
    %57 = vector.extract_strided_slice %42 {offsets = [0, 384], sizes = [8, 128], strides = [1, 1]} : vector<8x512xf32> to vector<8x128xf32>
    %58 = arith.negf %57 : vector<8x128xf32>
    %59 = math.exp %58 : vector<8x128xf32>
    %cst_45 = arith.constant 1.000000e+00 : f32
    %60 = vector.broadcast %cst_45 : f32 to vector<8x128xf32>
    %61 = arith.addf %60, %59 : vector<8x128xf32>
    %62 = arith.divf %60, %61 : vector<8x128xf32>
    %63 = arith.mulf %54, %35 : vector<8x128xf32>
    %64 = arith.mulf %48, %56 : vector<8x128xf32>
    %65 = arith.addf %63, %64 : vector<8x128xf32>
    %66 = math.tanh %65 : vector<8x128xf32>
    %67 = arith.mulf %62, %66 : vector<8x128xf32>
    %c1_i32 = arith.constant 1 : i32
    %c8_i32_46 = arith.constant 8 : i32
    %68 = arith.muli %c1_i32, %c8_i32_46 : i32
    %69 = tpu.assume_multiple %68, 8 : i32
    %70 = arith.index_cast %69 : i32 to index
    %c0_47 = arith.constant 0 : index
    %71 = vector.load %arg12[%70, %c0_47] : memref<64x512xf32, #tpu.memory_space<vmem>>, vector<8x512xf32>
    %c0_48 = arith.constant 0 : index
    %c0_49 = arith.constant 0 : index
    %72 = vector.load %arg5[%c0_48, %c0_49] : memref<128x512xf32, #tpu.memory_space<vmem>>, vector<128x512xf32>
    %cst_50 = arith.constant dense<0.000000e+00> : vector<8x512xf32>
    %73 = tpu.matmul %67, %72, %cst_50 {dimension_numbers = #tpu.dot_dimension_numbers<[1], [0], [0], [1], [0, 0, 1, 1], [], []>} : vector<8x128xf32>, vector<128x512xf32>, vector<8x512xf32> -> vector<8x512xf32>
    %74 = arith.addf %71, %73 : vector<8x512xf32>
    %75 = vector.extract_strided_slice %74 {offsets = [0, 0], sizes = [8, 128], strides = [1, 1]} : vector<8x512xf32> to vector<8x128xf32>
    %76 = arith.negf %75 : vector<8x128xf32>
    %77 = math.exp %76 : vector<8x128xf32>
    %cst_51 = arith.constant 1.000000e+00 : f32
    %78 = vector.broadcast %cst_51 : f32 to vector<8x128xf32>
    %79 = arith.addf %78, %77 : vector<8x128xf32>
    %80 = arith.divf %78, %79 : vector<8x128xf32>
    %81 = vector.extract_strided_slice %74 {offsets = [0, 128], sizes = [8, 128], strides = [1, 1]} : vector<8x512xf32> to vector<8x128xf32>
    %82 = arith.negf %81 : vector<8x128xf32>
    %83 = math.exp %82 : vector<8x128xf32>
    %cst_52 = arith.constant 1.000000e+00 : f32
    %84 = vector.broadcast %cst_52 : f32 to vector<8x128xf32>
    %85 = arith.addf %84, %83 : vector<8x128xf32>
    %86 = arith.divf %84, %85 : vector<8x128xf32>
    %87 = vector.extract_strided_slice %74 {offsets = [0, 256], sizes = [8, 128], strides = [1, 1]} : vector<8x512xf32> to vector<8x128xf32>
    %88 = math.tanh %87 : vector<8x128xf32>
    %89 = vector.extract_strided_slice %74 {offsets = [0, 384], sizes = [8, 128], strides = [1, 1]} : vector<8x512xf32> to vector<8x128xf32>
    %90 = arith.negf %89 : vector<8x128xf32>
    %91 = math.exp %90 : vector<8x128xf32>
    %cst_53 = arith.constant 1.000000e+00 : f32
    %92 = vector.broadcast %cst_53 : f32 to vector<8x128xf32>
    %93 = arith.addf %92, %91 : vector<8x128xf32>
    %94 = arith.divf %92, %93 : vector<8x128xf32>
    %95 = arith.mulf %86, %65 : vector<8x128xf32>
    %96 = arith.mulf %80, %88 : vector<8x128xf32>
    %97 = arith.addf %95, %96 : vector<8x128xf32>
    %98 = math.tanh %97 : vector<8x128xf32>
    %99 = arith.mulf %94, %98 : vector<8x128xf32>
    %c2_i32 = arith.constant 2 : i32
    %c8_i32_54 = arith.constant 8 : i32
    %100 = arith.muli %c2_i32, %c8_i32_54 : i32
    %101 = tpu.assume_multiple %100, 8 : i32
    %102 = arith.index_cast %101 : i32 to index
    %c0_55 = arith.constant 0 : index
    %103 = vector.load %arg12[%102, %c0_55] : memref<64x512xf32, #tpu.memory_space<vmem>>, vector<8x512xf32>
    %c0_56 = arith.constant 0 : index
    %c0_57 = arith.constant 0 : index
    %104 = vector.load %arg5[%c0_56, %c0_57] : memref<128x512xf32, #tpu.memory_space<vmem>>, vector<128x512xf32>
    %cst_58 = arith.constant dense<0.000000e+00> : vector<8x512xf32>
    %105 = tpu.matmul %99, %104, %cst_58 {dimension_numbers = #tpu.dot_dimension_numbers<[1], [0], [0], [1], [0, 0, 1, 1], [], []>} : vector<8x128xf32>, vector<128x512xf32>, vector<8x512xf32> -> vector<8x512xf32>
    %106 = arith.addf %103, %105 : vector<8x512xf32>
    %107 = vector.extract_strided_slice %106 {offsets = [0, 0], sizes = [8, 128], strides = [1, 1]} : vector<8x512xf32> to vector<8x128xf32>
    %108 = arith.negf %107 : vector<8x128xf32>
    %109 = math.exp %108 : vector<8x128xf32>
    %cst_59 = arith.constant 1.000000e+00 : f32
    %110 = vector.broadcast %cst_59 : f32 to vector<8x128xf32>
    %111 = arith.addf %110, %109 : vector<8x128xf32>
    %112 = arith.divf %110, %111 : vector<8x128xf32>
    %113 = vector.extract_strided_slice %106 {offsets = [0, 128], sizes = [8, 128], strides = [1, 1]} : vector<8x512xf32> to vector<8x128xf32>
    %114 = arith.negf %113 : vector<8x128xf32>
    %115 = math.exp %114 : vector<8x128xf32>
    %cst_60 = arith.constant 1.000000e+00 : f32
    %116 = vector.broadcast %cst_60 : f32 to vector<8x128xf32>
    %117 = arith.addf %116, %115 : vector<8x128xf32>
    %118 = arith.divf %116, %117 : vector<8x128xf32>
    %119 = vector.extract_strided_slice %106 {offsets = [0, 256], sizes = [8, 128], strides = [1, 1]} : vector<8x512xf32> to vector<8x128xf32>
    %120 = math.tanh %119 : vector<8x128xf32>
    %121 = vector.extract_strided_slice %106 {offsets = [0, 384], sizes = [8, 128], strides = [1, 1]} : vector<8x512xf32> to vector<8x128xf32>
    %122 = arith.negf %121 : vector<8x128xf32>
    %123 = math.exp %122 : vector<8x128xf32>
    %cst_61 = arith.constant 1.000000e+00 : f32
    %124 = vector.broadcast %cst_61 : f32 to vector<8x128xf32>
    %125 = arith.addf %124, %123 : vector<8x128xf32>
    %126 = arith.divf %124, %125 : vector<8x128xf32>
    %127 = arith.mulf %118, %97 : vector<8x128xf32>
    %128 = arith.mulf %112, %120 : vector<8x128xf32>
    %129 = arith.addf %127, %128 : vector<8x128xf32>
    %130 = math.tanh %129 : vector<8x128xf32>
    %131 = arith.mulf %126, %130 : vector<8x128xf32>
    %c3_i32 = arith.constant 3 : i32
    %c8_i32_62 = arith.constant 8 : i32
    %132 = arith.muli %c3_i32, %c8_i32_62 : i32
    %133 = tpu.assume_multiple %132, 8 : i32
    %134 = arith.index_cast %133 : i32 to index
    %c0_63 = arith.constant 0 : index
    %135 = vector.load %arg12[%134, %c0_63] : memref<64x512xf32, #tpu.memory_space<vmem>>, vector<8x512xf32>
    %c0_64 = arith.constant 0 : index
    %c0_65 = arith.constant 0 : index
    %136 = vector.load %arg5[%c0_64, %c0_65] : memref<128x512xf32, #tpu.memory_space<vmem>>, vector<128x512xf32>
    %cst_66 = arith.constant dense<0.000000e+00> : vector<8x512xf32>
    %137 = tpu.matmul %131, %136, %cst_66 {dimension_numbers = #tpu.dot_dimension_numbers<[1], [0], [0], [1], [0, 0, 1, 1], [], []>} : vector<8x128xf32>, vector<128x512xf32>, vector<8x512xf32> -> vector<8x512xf32>
    %138 = arith.addf %135, %137 : vector<8x512xf32>
    %139 = vector.extract_strided_slice %138 {offsets = [0, 0], sizes = [8, 128], strides = [1, 1]} : vector<8x512xf32> to vector<8x128xf32>
    %140 = arith.negf %139 : vector<8x128xf32>
    %141 = math.exp %140 : vector<8x128xf32>
    %cst_67 = arith.constant 1.000000e+00 : f32
    %142 = vector.broadcast %cst_67 : f32 to vector<8x128xf32>
    %143 = arith.addf %142, %141 : vector<8x128xf32>
    %144 = arith.divf %142, %143 : vector<8x128xf32>
    %145 = vector.extract_strided_slice %138 {offsets = [0, 128], sizes = [8, 128], strides = [1, 1]} : vector<8x512xf32> to vector<8x128xf32>
    %146 = arith.negf %145 : vector<8x128xf32>
    %147 = math.exp %146 : vector<8x128xf32>
    %cst_68 = arith.constant 1.000000e+00 : f32
    %148 = vector.broadcast %cst_68 : f32 to vector<8x128xf32>
    %149 = arith.addf %148, %147 : vector<8x128xf32>
    %150 = arith.divf %148, %149 : vector<8x128xf32>
    %151 = vector.extract_strided_slice %138 {offsets = [0, 256], sizes = [8, 128], strides = [1, 1]} : vector<8x512xf32> to vector<8x128xf32>
    %152 = math.tanh %151 : vector<8x128xf32>
    %153 = vector.extract_strided_slice %138 {offsets = [0, 384], sizes = [8, 128], strides = [1, 1]} : vector<8x512xf32> to vector<8x128xf32>
    %154 = arith.negf %153 : vector<8x128xf32>
    %155 = math.exp %154 : vector<8x128xf32>
    %cst_69 = arith.constant 1.000000e+00 : f32
    %156 = vector.broadcast %cst_69 : f32 to vector<8x128xf32>
    %157 = arith.addf %156, %155 : vector<8x128xf32>
    %158 = arith.divf %156, %157 : vector<8x128xf32>
    %159 = arith.mulf %150, %129 : vector<8x128xf32>
    %160 = arith.mulf %144, %152 : vector<8x128xf32>
    %161 = arith.addf %159, %160 : vector<8x128xf32>
    %162 = math.tanh %161 : vector<8x128xf32>
    %163 = arith.mulf %158, %162 : vector<8x128xf32>
    %c4_i32 = arith.constant 4 : i32
    %c8_i32_70 = arith.constant 8 : i32
    %164 = arith.muli %c4_i32, %c8_i32_70 : i32
    %165 = tpu.assume_multiple %164, 8 : i32
    %166 = arith.index_cast %165 : i32 to index
    %c0_71 = arith.constant 0 : index
    %167 = vector.load %arg12[%166, %c0_71] : memref<64x512xf32, #tpu.memory_space<vmem>>, vector<8x512xf32>
    %c0_72 = arith.constant 0 : index
    %c0_73 = arith.constant 0 : index
    %168 = vector.load %arg5[%c0_72, %c0_73] : memref<128x512xf32, #tpu.memory_space<vmem>>, vector<128x512xf32>
    %cst_74 = arith.constant dense<0.000000e+00> : vector<8x512xf32>
    %169 = tpu.matmul %163, %168, %cst_74 {dimension_numbers = #tpu.dot_dimension_numbers<[1], [0], [0], [1], [0, 0, 1, 1], [], []>} : vector<8x128xf32>, vector<128x512xf32>, vector<8x512xf32> -> vector<8x512xf32>
    %170 = arith.addf %167, %169 : vector<8x512xf32>
    %171 = vector.extract_strided_slice %170 {offsets = [0, 0], sizes = [8, 128], strides = [1, 1]} : vector<8x512xf32> to vector<8x128xf32>
    %172 = arith.negf %171 : vector<8x128xf32>
    %173 = math.exp %172 : vector<8x128xf32>
    %cst_75 = arith.constant 1.000000e+00 : f32
    %174 = vector.broadcast %cst_75 : f32 to vector<8x128xf32>
    %175 = arith.addf %174, %173 : vector<8x128xf32>
    %176 = arith.divf %174, %175 : vector<8x128xf32>
    %177 = vector.extract_strided_slice %170 {offsets = [0, 128], sizes = [8, 128], strides = [1, 1]} : vector<8x512xf32> to vector<8x128xf32>
    %178 = arith.negf %177 : vector<8x128xf32>
    %179 = math.exp %178 : vector<8x128xf32>
    %cst_76 = arith.constant 1.000000e+00 : f32
    %180 = vector.broadcast %cst_76 : f32 to vector<8x128xf32>
    %181 = arith.addf %180, %179 : vector<8x128xf32>
    %182 = arith.divf %180, %181 : vector<8x128xf32>
    %183 = vector.extract_strided_slice %170 {offsets = [0, 256], sizes = [8, 128], strides = [1, 1]} : vector<8x512xf32> to vector<8x128xf32>
    %184 = math.tanh %183 : vector<8x128xf32>
    %185 = vector.extract_strided_slice %170 {offsets = [0, 384], sizes = [8, 128], strides = [1, 1]} : vector<8x512xf32> to vector<8x128xf32>
    %186 = arith.negf %185 : vector<8x128xf32>
    %187 = math.exp %186 : vector<8x128xf32>
    %cst_77 = arith.constant 1.000000e+00 : f32
    %188 = vector.broadcast %cst_77 : f32 to vector<8x128xf32>
    %189 = arith.addf %188, %187 : vector<8x128xf32>
    %190 = arith.divf %188, %189 : vector<8x128xf32>
    %191 = arith.mulf %182, %161 : vector<8x128xf32>
    %192 = arith.mulf %176, %184 : vector<8x128xf32>
    %193 = arith.addf %191, %192 : vector<8x128xf32>
    %194 = math.tanh %193 : vector<8x128xf32>
    %195 = arith.mulf %190, %194 : vector<8x128xf32>
    %c5_i32 = arith.constant 5 : i32
    %c8_i32_78 = arith.constant 8 : i32
    %196 = arith.muli %c5_i32, %c8_i32_78 : i32
    %197 = tpu.assume_multiple %196, 8 : i32
    %198 = arith.index_cast %197 : i32 to index
    %c0_79 = arith.constant 0 : index
    %199 = vector.load %arg12[%198, %c0_79] : memref<64x512xf32, #tpu.memory_space<vmem>>, vector<8x512xf32>
    %c0_80 = arith.constant 0 : index
    %c0_81 = arith.constant 0 : index
    %200 = vector.load %arg5[%c0_80, %c0_81] : memref<128x512xf32, #tpu.memory_space<vmem>>, vector<128x512xf32>
    %cst_82 = arith.constant dense<0.000000e+00> : vector<8x512xf32>
    %201 = tpu.matmul %195, %200, %cst_82 {dimension_numbers = #tpu.dot_dimension_numbers<[1], [0], [0], [1], [0, 0, 1, 1], [], []>} : vector<8x128xf32>, vector<128x512xf32>, vector<8x512xf32> -> vector<8x512xf32>
    %202 = arith.addf %199, %201 : vector<8x512xf32>
    %203 = vector.extract_strided_slice %202 {offsets = [0, 0], sizes = [8, 128], strides = [1, 1]} : vector<8x512xf32> to vector<8x128xf32>
    %204 = arith.negf %203 : vector<8x128xf32>
    %205 = math.exp %204 : vector<8x128xf32>
    %cst_83 = arith.constant 1.000000e+00 : f32
    %206 = vector.broadcast %cst_83 : f32 to vector<8x128xf32>
    %207 = arith.addf %206, %205 : vector<8x128xf32>
    %208 = arith.divf %206, %207 : vector<8x128xf32>
    %209 = vector.extract_strided_slice %202 {offsets = [0, 128], sizes = [8, 128], strides = [1, 1]} : vector<8x512xf32> to vector<8x128xf32>
    %210 = arith.negf %209 : vector<8x128xf32>
    %211 = math.exp %210 : vector<8x128xf32>
    %cst_84 = arith.constant 1.000000e+00 : f32
    %212 = vector.broadcast %cst_84 : f32 to vector<8x128xf32>
    %213 = arith.addf %212, %211 : vector<8x128xf32>
    %214 = arith.divf %212, %213 : vector<8x128xf32>
    %215 = vector.extract_strided_slice %202 {offsets = [0, 256], sizes = [8, 128], strides = [1, 1]} : vector<8x512xf32> to vector<8x128xf32>
    %216 = math.tanh %215 : vector<8x128xf32>
    %217 = vector.extract_strided_slice %202 {offsets = [0, 384], sizes = [8, 128], strides = [1, 1]} : vector<8x512xf32> to vector<8x128xf32>
    %218 = arith.negf %217 : vector<8x128xf32>
    %219 = math.exp %218 : vector<8x128xf32>
    %cst_85 = arith.constant 1.000000e+00 : f32
    %220 = vector.broadcast %cst_85 : f32 to vector<8x128xf32>
    %221 = arith.addf %220, %219 : vector<8x128xf32>
    %222 = arith.divf %220, %221 : vector<8x128xf32>
    %223 = arith.mulf %214, %193 : vector<8x128xf32>
    %224 = arith.mulf %208, %216 : vector<8x128xf32>
    %225 = arith.addf %223, %224 : vector<8x128xf32>
    %226 = math.tanh %225 : vector<8x128xf32>
    %227 = arith.mulf %222, %226 : vector<8x128xf32>
    %c6_i32 = arith.constant 6 : i32
    %c8_i32_86 = arith.constant 8 : i32
    %228 = arith.muli %c6_i32, %c8_i32_86 : i32
    %229 = tpu.assume_multiple %228, 8 : i32
    %230 = arith.index_cast %229 : i32 to index
    %c0_87 = arith.constant 0 : index
    %231 = vector.load %arg12[%230, %c0_87] : memref<64x512xf32, #tpu.memory_space<vmem>>, vector<8x512xf32>
    %c0_88 = arith.constant 0 : index
    %c0_89 = arith.constant 0 : index
    %232 = vector.load %arg5[%c0_88, %c0_89] : memref<128x512xf32, #tpu.memory_space<vmem>>, vector<128x512xf32>
    %cst_90 = arith.constant dense<0.000000e+00> : vector<8x512xf32>
    %233 = tpu.matmul %227, %232, %cst_90 {dimension_numbers = #tpu.dot_dimension_numbers<[1], [0], [0], [1], [0, 0, 1, 1], [], []>} : vector<8x128xf32>, vector<128x512xf32>, vector<8x512xf32> -> vector<8x512xf32>
    %234 = arith.addf %231, %233 : vector<8x512xf32>
    %235 = vector.extract_strided_slice %234 {offsets = [0, 0], sizes = [8, 128], strides = [1, 1]} : vector<8x512xf32> to vector<8x128xf32>
    %236 = arith.negf %235 : vector<8x128xf32>
    %237 = math.exp %236 : vector<8x128xf32>
    %cst_91 = arith.constant 1.000000e+00 : f32
    %238 = vector.broadcast %cst_91 : f32 to vector<8x128xf32>
    %239 = arith.addf %238, %237 : vector<8x128xf32>
    %240 = arith.divf %238, %239 : vector<8x128xf32>
    %241 = vector.extract_strided_slice %234 {offsets = [0, 128], sizes = [8, 128], strides = [1, 1]} : vector<8x512xf32> to vector<8x128xf32>
    %242 = arith.negf %241 : vector<8x128xf32>
    %243 = math.exp %242 : vector<8x128xf32>
    %cst_92 = arith.constant 1.000000e+00 : f32
    %244 = vector.broadcast %cst_92 : f32 to vector<8x128xf32>
    %245 = arith.addf %244, %243 : vector<8x128xf32>
    %246 = arith.divf %244, %245 : vector<8x128xf32>
    %247 = vector.extract_strided_slice %234 {offsets = [0, 256], sizes = [8, 128], strides = [1, 1]} : vector<8x512xf32> to vector<8x128xf32>
    %248 = math.tanh %247 : vector<8x128xf32>
    %249 = vector.extract_strided_slice %234 {offsets = [0, 384], sizes = [8, 128], strides = [1, 1]} : vector<8x512xf32> to vector<8x128xf32>
    %250 = arith.negf %249 : vector<8x128xf32>
    %251 = math.exp %250 : vector<8x128xf32>
    %cst_93 = arith.constant 1.000000e+00 : f32
    %252 = vector.broadcast %cst_93 : f32 to vector<8x128xf32>
    %253 = arith.addf %252, %251 : vector<8x128xf32>
    %254 = arith.divf %252, %253 : vector<8x128xf32>
    %255 = arith.mulf %246, %225 : vector<8x128xf32>
    %256 = arith.mulf %240, %248 : vector<8x128xf32>
    %257 = arith.addf %255, %256 : vector<8x128xf32>
    %258 = math.tanh %257 : vector<8x128xf32>
    %259 = arith.mulf %254, %258 : vector<8x128xf32>
    %c7_i32 = arith.constant 7 : i32
    %c8_i32_94 = arith.constant 8 : i32
    %260 = arith.muli %c7_i32, %c8_i32_94 : i32
    %261 = tpu.assume_multiple %260, 8 : i32
    %262 = arith.index_cast %261 : i32 to index
    %c0_95 = arith.constant 0 : index
    %263 = vector.load %arg12[%262, %c0_95] : memref<64x512xf32, #tpu.memory_space<vmem>>, vector<8x512xf32>
    %c0_96 = arith.constant 0 : index
    %c0_97 = arith.constant 0 : index
    %264 = vector.load %arg5[%c0_96, %c0_97] : memref<128x512xf32, #tpu.memory_space<vmem>>, vector<128x512xf32>
    %cst_98 = arith.constant dense<0.000000e+00> : vector<8x512xf32>
    %265 = tpu.matmul %259, %264, %cst_98 {dimension_numbers = #tpu.dot_dimension_numbers<[1], [0], [0], [1], [0, 0, 1, 1], [], []>} : vector<8x128xf32>, vector<128x512xf32>, vector<8x512xf32> -> vector<8x512xf32>
    %266 = arith.addf %263, %265 : vector<8x512xf32>
    %267 = vector.extract_strided_slice %266 {offsets = [0, 0], sizes = [8, 128], strides = [1, 1]} : vector<8x512xf32> to vector<8x128xf32>
    %268 = arith.negf %267 : vector<8x128xf32>
    %269 = math.exp %268 : vector<8x128xf32>
    %cst_99 = arith.constant 1.000000e+00 : f32
    %270 = vector.broadcast %cst_99 : f32 to vector<8x128xf32>
    %271 = arith.addf %270, %269 : vector<8x128xf32>
    %272 = arith.divf %270, %271 : vector<8x128xf32>
    %273 = vector.extract_strided_slice %266 {offsets = [0, 128], sizes = [8, 128], strides = [1, 1]} : vector<8x512xf32> to vector<8x128xf32>
    %274 = arith.negf %273 : vector<8x128xf32>
    %275 = math.exp %274 : vector<8x128xf32>
    %cst_100 = arith.constant 1.000000e+00 : f32
    %276 = vector.broadcast %cst_100 : f32 to vector<8x128xf32>
    %277 = arith.addf %276, %275 : vector<8x128xf32>
    %278 = arith.divf %276, %277 : vector<8x128xf32>
    %279 = vector.extract_strided_slice %266 {offsets = [0, 256], sizes = [8, 128], strides = [1, 1]} : vector<8x512xf32> to vector<8x128xf32>
    %280 = math.tanh %279 : vector<8x128xf32>
    %281 = vector.extract_strided_slice %266 {offsets = [0, 384], sizes = [8, 128], strides = [1, 1]} : vector<8x512xf32> to vector<8x128xf32>
    %282 = arith.negf %281 : vector<8x128xf32>
    %283 = math.exp %282 : vector<8x128xf32>
    %cst_101 = arith.constant 1.000000e+00 : f32
    %284 = vector.broadcast %cst_101 : f32 to vector<8x128xf32>
    %285 = arith.addf %284, %283 : vector<8x128xf32>
    %286 = arith.divf %284, %285 : vector<8x128xf32>
    %287 = arith.mulf %278, %257 : vector<8x128xf32>
    %288 = arith.mulf %272, %280 : vector<8x128xf32>
    %289 = arith.addf %287, %288 : vector<8x128xf32>
    %290 = math.tanh %289 : vector<8x128xf32>
    %291 = arith.mulf %286, %290 : vector<8x128xf32>
    %c8_i32_102 = arith.constant 8 : i32
    %c0_103 = arith.constant 0 : index
    %c0_104 = arith.constant 0 : index
    %292 = vector.load %arg9[%c0_103, %c0_104] : memref<8x128xf32, #tpu.memory_space<vmem>>, vector<8x128xf32>
    tpu.vector_store %arg9[%c0_103, %c0_104], %291 {strides = array<i32>} : memref<8x128xf32, #tpu.memory_space<vmem>>, vector<8x128xf32>,
    %c0_105 = arith.constant 0 : index
    %c0_106 = arith.constant 0 : index
    %293 = vector.load %arg10[%c0_105, %c0_106] : memref<8x128xf32, #tpu.memory_space<vmem>>, vector<8x128xf32>
    tpu.vector_store %arg10[%c0_105, %c0_106], %289 {strides = array<i32>} : memref<8x128xf32, #tpu.memory_space<vmem>>, vector<8x128xf32>,
    %c0_i32_107 = arith.constant 0 : i32
    %294 = arith.cmpi eq, %arg1, %c0_i32_107 : i32
    %295 = arith.extui %294 : i1 to i32
    %c0_i32_108 = arith.constant 0 : i32
    %296 = arith.cmpi ne, %295, %c0_i32_108 : i32
    scf.if %296 {
      %c0_109 = arith.constant 0 : index
      %c0_110 = arith.constant 0 : index
      %297 = vector.load %arg10[%c0_109, %c0_110] : memref<8x128xf32, #tpu.memory_space<vmem>>, vector<8x128xf32>
      %c0_111 = arith.constant 0 : index
      %c0_112 = arith.constant 0 : index
      %298 = vector.load %arg6[%c0_111, %c0_112] : memref<128x128xf32, #tpu.memory_space<vmem>>, vector<128x128xf32>
      %cst_113 = arith.constant dense<0.000000e+00> : vector<8x128xf32>
      %299 = tpu.matmul %297, %298, %cst_113 {dimension_numbers = #tpu.dot_dimension_numbers<[1], [0], [0], [1], [0, 0, 1, 1], [], []>} : vector<8x128xf32>, vector<128x128xf32>, vector<8x128xf32> -> vector<8x128xf32>
      %c0_114 = arith.constant 0 : index
      %c0_115 = arith.constant 0 : index
      %300 = vector.load %arg7[%c0_114, %c0_115] : memref<1x128xf32, #tpu.memory_space<vmem>>, vector<1x128xf32>
      %301 = vector.broadcast %300 : vector<1x128xf32> to vector<8x128xf32>
      %302 = arith.addf %299, %301 : vector<8x128xf32>
      %303 = vector.extract_strided_slice %302 {offsets = [0, 0], sizes = [4, 128], strides = [1, 1]} : vector<8x128xf32> to vector<4x128xf32>
      %c0_116 = arith.constant 0 : index
      %c0_117 = arith.constant 0 : index
      %304 = vector.load %arg8[%c0_116, %c0_117] : memref<4x128xf32, #tpu.memory_space<vmem>>, vector<4x128xf32>
      tpu.vector_store %arg8[%c0_116, %c0_117], %303 {strides = array<i32>} : memref<4x128xf32, #tpu.memory_space<vmem>>, vector<4x128xf32>,
    } else {
    }
    return
  }
  func.func @transform_0(%arg0: i32, %arg1: i32) -> (i32, i32, i32) {
    %c0_i32 = arith.constant 0 : i32
    %c0_i32_0 = arith.constant 0 : i32
    return %arg0, %arg1, %c0_i32 : i32, i32, i32
  }
  func.func @transform_1(%arg0: i32, %arg1: i32) -> (i32, i32) {
    %c0_i32 = arith.constant 0 : i32
    %c0_i32_0 = arith.constant 0 : i32
    %c0_i32_1 = arith.constant 0 : i32
    return %c0_i32, %c0_i32_0 : i32, i32
  }
  func.func @transform_2(%arg0: i32, %arg1: i32) -> (i32, i32) {
    %c0_i32 = arith.constant 0 : i32
    %c0_i32_0 = arith.constant 0 : i32
    %c0_i32_1 = arith.constant 0 : i32
    return %c0_i32, %c0_i32_0 : i32, i32
  }
  func.func @transform_3(%arg0: i32, %arg1: i32) -> (i32, i32) {
    %c0_i32 = arith.constant 0 : i32
    %c0_i32_0 = arith.constant 0 : i32
    %c0_i32_1 = arith.constant 0 : i32
    return %c0_i32, %c0_i32_0 : i32, i32
  }
  func.func @transform_4(%arg0: i32, %arg1: i32) -> (i32, i32) {
    %c0_i32 = arith.constant 0 : i32
    %c0_i32_0 = arith.constant 0 : i32
    %c0_i32_1 = arith.constant 0 : i32
    return %c0_i32, %c0_i32_0 : i32, i32
  }
  func.func @transform_5(%arg0: i32, %arg1: i32) -> (i32, i32) {
    %c0_i32 = arith.constant 0 : i32
    %c0_i32_0 = arith.constant 0 : i32
    %c0_i32_1 = arith.constant 0 : i32
    return %c0_i32, %c0_i32_0 : i32, i32
  }
  func.func @transform_6(%arg0: i32, %arg1: i32) -> (i32, i32) {
    %c0_i32 = arith.constant 0 : i32
    %c0_i32_0 = arith.constant 0 : i32
    return %arg0, %c0_i32 : i32, i32
  }
}

</mosaic_0001>

<bundles_post_ra>
// kernel: tpu_custom_call.1
= control target key start
LH: loop header
LB: loop body
LE: loop exit
PB: predicated region body
PF: predicated region fallthrough
CT: control target
= control target key end

     0   :  { %11 = vsyncpa [#allocation7], 0  ;;  %s3723_s0 = inlined_call_operand.hbm [shape: f32[4,8,16], index: 0, kind: input, shape index: {}]   ;;  %s3724_s1 = inlined_call_operand.hbm [shape: f32[16,512], index: 1, kind: input, shape index: {}]   ;;  %s3725_s2 = inlined_call_operand.vmem [shape: f32[1,512], index: 2, kind: input, shape index: {}]   ;;  %s3726_s3 = inlined_call_operand.hbm [shape: f32[128,512], index: 3, kind: input, shape index: {}]   ;;  %s3727_s4 = inlined_call_operand.hbm [shape: f32[128,128], index: 4, kind: input, shape index: {}]   ;;  %s3728_s5 = inlined_call_operand.vmem [shape: f32[1,128], index: 5, kind: input, shape index: {}]   ;;  %s3729_s6 = inlined_call_operand.hbm [shape: f32[4,128], index: 6, kind: output, shape index: {}]  }
   0x1   :  { %12 = vsyncpa [#allocation10], 0 }
   0x2   :  { %13 = vsyncpa [#allocation13], 0 }
   0x3   :  { %14 = vsyncpa [#allocation8], 0  ;;  %s3105_s21 = smov [#allocation9]   ;;  %s2987_s25 = scalar_lea.hbm %s3724_s1, 1024 }
   0x4   :  { %s32_s22 = sshll.u32 %s3105_s21, 4  ;;  %p2988_p0 = scmp.ne.s32.totalorder %s3724_s1, %s2987_s25  ;;  %s33_s22 = int_to_ptr.vmem [resolvable:$true] %s32_s22 }
   0x5   :  { %p2991_p1 = scmp.lt.u32.totalorder %s2987_s25, %s3724_s1 }
   0x7   :  { %p2993_p2 = pnand %p2991_p1, %p2988_p0 }
   0x9   :  { %2996 = shalt.err (!%p2993_p2)
}
   0xa   :  { %s2997_s30 = scalar_lea.vmem %s33_s22, 1024  ;;  %p3002_p4 = scmp.lt.s32.totalorder %s33_s22, %s33_s22 }
   0xb   :  { %p2998_p3 = scmp.ne.s32.totalorder %s33_s22, %s2997_s30  ;;  %p3003_p5 = scmp.lt.s32.totalorder %s2997_s30, %s2997_s30 }
   0xd   :  { %p3004_p6 = por %p3003_p5, %p3002_p4 }
   0xf   :  { %p3005_p7 = pnand %p3004_p6, %p2998_p3 }
  0x11   :  { %3008 = shalt.err (!%p3005_p7)
}
  0x12   :  { %s3106_s7 = smov 512   ;;  %s3107_s8 = smov 32  }
  0x13   :  { %38 = dma.hbm_to_vmem [thread:$0]  %s3724_s1, 1024, %s33_s22, [#allocation10], %s3106_s7, %s3106_s7, %s3107_s8  }
  0x14   :  { %s3108_s11 = smov [#allocation6]   ;;  %s3009_s15 = scalar_lea.hbm %s3723_s0, 512 }
  0x15   :  { %s20_s12 = sshll.u32 %s3108_s11, 4  ;;  %p3010_p8 = scmp.ne.s32.totalorder %s3723_s0, %s3009_s15  ;;  %s21_s12 = int_to_ptr.vmem [resolvable:$true] %s20_s12 }
  0x16   :  { %p3013_p9 = scmp.lt.u32.totalorder %s3009_s15, %s3723_s0 }
  0x18   :  { %p3015_p10 = pnand %p3013_p9, %p3010_p8 }
  0x1a   :  { %3018 = shalt.err (!%p3015_p10)
}
  0x1b   :  { %s3019_s20 = scalar_lea.vmem %s21_s12, 512  ;;  %p3024_p12 = scmp.lt.s32.totalorder %s21_s12, %s21_s12 }
  0x1c   :  { %p3020_p11 = scmp.ne.s32.totalorder %s21_s12, %s3019_s20  ;;  %p3025_p13 = scmp.lt.s32.totalorder %s3019_s20, %s3019_s20 }
  0x1e   :  { %p3026_p0 = por %p3025_p13, %p3024_p12 }
  0x20   :  { %p3027_p1 = pnand %p3026_p0, %p3020_p11 }
  0x22   :  { %3030 = shalt.err (!%p3027_p1)
}
  0x23   :  { %s3109_s1 = smov 128   ;;  %s3110_s21 = smov 8  }
  0x24   :  { %26 = dma.hbm_to_vmem [thread:$0]  %s3723_s0, 512, %s21_s12, [#allocation7], %s3109_s1, %s3109_s1, %s3110_s21  }
  0x25   :  { %s3111_s24 = smov [#allocation11]   ;;  %s3112_s26 = smov [#allocation12]  }
  0x26   :  { %s46_s25 = sshll.u32 %s3111_s24, 4  ;;  %s58_s27 = sshll.u32 %s3112_s26, 4  ;;  %s47_s25 = int_to_ptr.vmem [resolvable:$true] %s46_s25  ;;  %s3182_s27 = int_to_ptr.vmem [resolvable:$true] %s58_s27 }
  0x27   :  { %s3031_s30 = scalar_lea.hbm %s3726_s3, 8192 }
  0x28   :  { %p3032_p2 = scmp.ne.s32.totalorder %s3726_s3, %s3031_s30  ;;  %p3035_p3 = scmp.lt.u32.totalorder %s3031_s30, %s3726_s3 }
  0x2a   :  { %p3037_p4 = pnand %p3035_p3, %p3032_p2 }
  0x2c   :  { %3040 = shalt.err (!%p3037_p4)
}
  0x2d   :  { %s3041_s0 = scalar_lea.vmem %s47_s25, 8192  ;;  %p3046_p6 = scmp.lt.s32.totalorder %s47_s25, %s47_s25 }
  0x2e   :  { %p3042_p5 = scmp.ne.s32.totalorder %s47_s25, %s3041_s0  ;;  %p3047_p7 = scmp.lt.s32.totalorder %s3041_s0, %s3041_s0 }
  0x30   :  { %p3048_p8 = por %p3047_p7, %p3046_p6 }
  0x32   :  { %p3049_p9 = pnand %p3048_p8, %p3042_p5 }
  0x34   :  { %3052 = shalt.err (!%p3049_p9)
}
  0x35   :  { %52 = dma.hbm_to_vmem [thread:$0]  %s3726_s3, 8192, %s47_s25, [#allocation10], %s3106_s7, %s3106_s7, %s3107_s8  }
  0x36   :  { %s3053_s17 = scalar_lea.hbm %s3727_s4, 2048 }
  0x37   :  { %p3054_p10 = scmp.ne.s32.totalorder %s3727_s4, %s3053_s17  ;;  %p3057_p11 = scmp.lt.u32.totalorder %s3053_s17, %s3727_s4 }
  0x39   :  { %p3059_p12 = pnand %p3057_p11, %p3054_p10 }
  0x3b   :  { %3062 = shalt.err (!%p3059_p12)
}
  0x3c   :  { %s3063_s23 = scalar_lea.vmem %s3182_s27, 2048  ;;  %p3068_p0 = scmp.lt.s32.totalorder %s3182_s27, %s3182_s27 }
  0x3d   :  { %p3064_p13 = scmp.ne.s32.totalorder %s3182_s27, %s3063_s23  ;;  %p3069_p1 = scmp.lt.s32.totalorder %s3063_s23, %s3063_s23 }
  0x3f   :  { %p3070_p2 = por %p3069_p1, %p3068_p0 }
  0x41   :  { %p3071_p3 = pnand %p3070_p2, %p3064_p13 }
  0x43   :  { %3074 = shalt.err (!%p3071_p3)
}
  0x44   :  { %64 = dma.hbm_to_vmem [thread:$0]  %s3727_s4, 2048, %s3182_s27, [#allocation13], %s3109_s1, %s3109_s1, %s3110_s21  }
  0x45   :  { %3097 = dma.done.wait [#allocation7], 512  }
  0x46   :  { %3098 = vsyncadd [#allocation7], 4294966784 }
  0x47   :  { %3099 = dma.done.wait [#allocation10], 9216  }
  0x48   :  { %3100 = vsyncadd [#allocation10], 4294958080 }
  0x49   :  { %3101 = dma.done.wait [#allocation13], 2048  }
  0x4a   :  { %3102 = vsyncadd [#allocation13], 4294965248  ;;  %vm85_vm0 = vcmask 130048   ;;  %v3113_v0 = vmov 0.0   ;;  %v235_v1 = vld [vmem:[#allocation9 + $0x8] sm:$0xff]  ;;  %v234_v3 = vld [vmem:[#allocation9] sm:$0xff] }
  0x4b   :  { %353 = vmatprep.mubr.f32.mxu0 %v3113_v0  ;;  %466 = vmatprep.mubr.f32.mxu1 %v3113_v0  ;;  %86 = vst.msk [vmem:[#allocation4] sm:$0xff] %vm85_vm0, %v3113_v0  ;;  %87 = vst.msk [vmem:[#allocation4 + $0x8] sm:$0xff] %vm85_vm0, %v3113_v0  ;;  %v239_v2 = vld [vmem:[#allocation9 + $0x28] sm:$0xff]  ;;  %v238_v5 = vld [vmem:[#allocation9 + $0x20] sm:$0xff]  ;;  %vm103_vm1 = vcmask 1041409   ;;  %vm106_vm2 = vcmask 1042434  }
  0x4c   :  { %88 = vst.msk [vmem:[#allocation4 + $0x10] sm:$0xff] %vm85_vm0, %v3113_v0  ;;  %89 = vst.msk [vmem:[#allocation4 + $0x18] sm:$0xff] %vm85_vm0, %v3113_v0  ;;  %v2246_v4 = vpack.c.bf16 %v239_v2, %v235_v1  ;;  %v237_v6 = vld [vmem:[#allocation9 + $0x18] sm:$0xff]  ;;  %v2248_v8 = vpack.c.bf16 %v238_v5, %v234_v3  ;;  %v236_v10 = vld [vmem:[#allocation9 + $0x10] sm:$0xff]  ;;  %vm109_vm3 = vcmask 1043459   ;;  %vm112_vm4 = vcmask 125952  }
  0x4d   :  { %90 = vst.msk [vmem:[#allocation4 + $0x20] sm:$0xff] %vm85_vm0, %v3113_v0  ;;  %91 = vst.msk [vmem:[#allocation4 + $0x28] sm:$0xff] %vm85_vm0, %v3113_v0  ;;  %v241_v7 = vld [vmem:[#allocation9 + $0x38] sm:$0xff]  ;;  %v240_v11 = vld [vmem:[#allocation9 + $0x30] sm:$0xff]  ;;  %vm3115_vm5 = vmmov 0   ;;  %s3116_s21 = smov [#allocation14]  }
  0x4e   :  { %92 = vst.msk [vmem:[#allocation4 + $0x30] sm:$0xff] %vm85_vm0, %v3113_v0  ;;  %93 = vst.msk [vmem:[#allocation4 + $0x38] sm:$0xff] %vm85_vm0, %v3113_v0  ;;  %v2250_v9 = vpack.c.bf16 %v241_v7, %v237_v6  ;;  %v557_v12 = vld [vmem:[#allocation11 + $0x8] sm:$0xff]  ;;  %2247 = vmatprep.subr.bf16.mxu0 %v2246_v4  ;;  %v2252_v13 = vpack.c.bf16 %v240_v11, %v236_v10  ;;  %v94_v15 = vld [vmem:[#allocation6] sm:$0x1]  ;;  %s2135_s24 = sshll.u32 %s3116_s21, 4  ;;  %s2136_s24 = int_to_ptr.vmem [resolvable:$true] %s2135_s24 }
  0x4f   :  { %v561_v14 = vld [vmem:[#allocation11 + $0x28] sm:$0xff]  ;;  %2249 = vmatpush1.bf16.msra.mxu0 %v2248_v8  ;;  %v96_v18 = vld [vmem:[#allocation6 + $0x10] sm:$0x1]  ;;  %v97_v19 = vld [vmem:[#allocation6 + $0x18] sm:$0x1]  ;;  %s3075_s25 = scalar_lea.vmem %s2136_s24, 64  ;;  %p3080_p5 = scmp.lt.s32.totalorder %s2136_s24, %s2136_s24 }
  0x50   :  { %v95_v16 = vld [vmem:[#allocation6 + $0x8] sm:$0x1]  ;;  %2251 = vmatprep.subr.bf16.mxu1 %v2250_v9  ;;  %v3237_v17 = vpack.c.bf16 %v561_v14, %v557_v12  ;;  %v105_v21 = vrot.slane %v96_v18, 6  ;;  %v108_v22 = vrot.slane %v97_v19, 5  ;;  %v559_v23 = vld [vmem:[#allocation11 + $0x18] sm:$0xff]  ;;  %v556_v34 = vld [vmem:[#allocation11] sm:$0xff]  ;;  %p3076_p4 = scmp.ne.s32.totalorder %s2136_s24, %s3075_s25  ;;  %p3081_p6 = scmp.lt.s32.totalorder %s3075_s25, %s3075_s25 }
  0x51   :  { %v102_v20 = vrot.slane %v95_v16, 7  ;;  %2253 = vmatpush1.bf16.msra.mxu1 %v2252_v13  ;;  %v563_v24 = vld [vmem:[#allocation11 + $0x38] sm:$0xff]  ;;  %v114_v28 = vld [vmem:[#allocation6 + $0x1] sm:$0x1]  ;;  %v115_v29 = vld [vmem:[#allocation6 + $0x9] sm:$0x1] }
  0x52   :  { %2255 = vmatprep.subr.bf16.mxu0 %v3237_v17  ;;  %v3241_v26 = vpack.c.bf16 %v563_v24, %v559_v23  ;;  %v116_v31 = vld [vmem:[#allocation6 + $0x11] sm:$0x1]  ;;  %v117_v32 = vld [vmem:[#allocation6 + $0x19] sm:$0x1]  ;;  %v122_v33 = vrot.slane %v115_v29, 7  ;;  %v560_v37 = vld [vmem:[#allocation11 + $0x20] sm:$0xff]  ;;  %p3082_p7 = por %p3081_p6, %p3080_p5 }
  0x53   :  { %v104_v25 = vsel %vm103_vm1, %v102_v20, %v94_v15  ;;  %v124_v35 = vrot.slane %v116_v31, 6  ;;  %v126_v36 = vrot.slane %v117_v32, 5  ;;  %v558_v38 = vld [vmem:[#allocation11 + $0x10] sm:$0xff]  ;;  %v565_v41 = vld [vmem:[#allocation11 + $0x48] sm:$0xff]  ;;  %v130_v43 = vld [vmem:[#allocation6 + $0x2] sm:$0x1]  ;;  %v3251_v55 = vpack.c.bf16 %v560_v37, %v556_v34 }
  0x54   :  { %v107_v27 = vsel %vm106_vm2, %v105_v21, %v104_v25  ;;  %2287 = vmatprep.subr.bf16.mxu1 %v3241_v26  ;;  %v562_v39 = vld [vmem:[#allocation11 + $0x30] sm:$0xff]  ;;  %v123_v40 = vsel %vm103_vm1, %v122_v33, %v114_v28  ;;  %v131_v44 = vld [vmem:[#allocation6 + $0xa] sm:$0x1]  ;;  %v133_v48 = vld [vmem:[#allocation6 + $0x1a] sm:$0x1]  ;;  %p3083_p8 = pnand %p3082_p7, %p3076_p4 }
  0x55   :  { %v110_v30 = vsel %vm109_vm3, %v108_v22, %v107_v27  ;;  %v125_v42 = vsel %vm106_vm2, %v124_v35, %v123_v40  ;;  %v569_v45 = vld [vmem:[#allocation11 + $0x68] sm:$0xff]  ;;  %v132_v47 = vld [vmem:[#allocation6 + $0x12] sm:$0x1]  ;;  %v138_v49 = vrot.slane %v131_v44, 7  ;;  %v564_v50 = vld [vmem:[#allocation11 + $0x40] sm:$0xff]  ;;  %v142_v54 = vrot.slane %v133_v48, 5 }
  0x56   :  { %113 = vst.msk [vmem:[#allocation4] sm:$0xf] %vm112_vm4, %v110_v30  ;;  %v127_v46 = vsel %vm109_vm3, %v126_v36, %v125_v42  ;;  %v567_v51 = vld [vmem:[#allocation11 + $0x58] sm:$0xff]  ;;  %v140_v53 = vrot.slane %v132_v47, 6  ;;  %v3253_v56 = vpack.c.bf16 %v562_v39, %v558_v38  ;;  %v568_v57 = vld [vmem:[#allocation11 + $0x60] sm:$0xff]  ;;  %v566_v58 = vld [vmem:[#allocation11 + $0x50] sm:$0xff]  ;;  %v3257_v4 = vpack.c.bf16 %v569_v45, %v565_v41 }
  0x57   :  { %129 = vst.msk [vmem:[#allocation4 + $0x8] sm:$0xf] %vm112_vm4, %v127_v46  ;;  %v571_v52 = vld [vmem:[#allocation11 + $0x78] sm:$0xff]  ;;  %v570_v59 = vld [vmem:[#allocation11 + $0x70] sm:$0xff]  ;;  %v139_v60 = vsel %vm103_vm1, %v138_v49, %v130_v43  ;;  %v573_v61 = vld [vmem:[#allocation11 + $0x88] sm:$0xff]  ;;  %v3267_v15 = vpack.c.bf16 %v568_v57, %v564_v50 }
  0x58   :  { %v577_v62 = vld [vmem:[#allocation11 + $0xa8] sm:$0xff]  ;;  %v141_v63 = vsel %vm106_vm2, %v140_v53, %v139_v60  ;;  %v146_v1 = vld [vmem:[#allocation6 + $0x3] sm:$0x1]  ;;  %v3259_v5 = vpack.c.bf16 %v571_v52, %v567_v51  ;;  %v148_v7 = vld [vmem:[#allocation6 + $0x13] sm:$0x1]  ;;  %v3269_v16 = vpack.c.bf16 %v570_v59, %v566_v58 }
  0x59   :  { %v147_v2 = vld [vmem:[#allocation6 + $0xb] sm:$0x1]  ;;  %v143_v6 = vsel %vm109_vm3, %v142_v54, %v141_v63  ;;  %v149_v8 = vld [vmem:[#allocation6 + $0x1b] sm:$0x1]  ;;  %v572_v10 = vld [vmem:[#allocation11 + $0x80] sm:$0xff]  ;;  %v156_v13 = vrot.slane %v148_v7, 6  ;;  %v3277_v28 = vpack.c.bf16 %v577_v62, %v573_v61 }
  0x5a   :  { %v154_v9 = vrot.slane %v147_v2, 7  ;;  %145 = vst.msk [vmem:[#allocation4 + $0x10] sm:$0xf] %vm112_vm4, %v143_v6  ;;  %v575_v11 = vld [vmem:[#allocation11 + $0x98] sm:$0xff]  ;;  %v158_v14 = vrot.slane %v149_v8, 5  ;;  %v576_v18 = vld [vmem:[#allocation11 + $0xa0] sm:$0xff] }
  0x5b   :  { %v579_v12 = vld [vmem:[#allocation11 + $0xb8] sm:$0xff]  ;;  %v574_v19 = vld [vmem:[#allocation11 + $0x90] sm:$0xff]  ;;  %v581_v22 = vld [vmem:[#allocation11 + $0xc8] sm:$0xff]  ;;  %v3287_v39 = vpack.c.bf16 %v576_v18, %v572_v10 }
  0x5c   :  { %v578_v20 = vld [vmem:[#allocation11 + $0xb0] sm:$0xff]  ;;  %v155_v21 = vsel %vm103_vm1, %v154_v9, %v146_v1  ;;  %v585_v23 = vld [vmem:[#allocation11 + $0xe8] sm:$0xff]  ;;  %v162_v25 = vld [vmem:[#allocation6 + $0x4] sm:$0x1]  ;;  %v3279_v29 = vpack.c.bf16 %v579_v12, %v575_v11 }
  0x5d   :  { %v226_v3 = vld [vmem:[#allocation4] sm:$0xff]  ;;  %v157_v24 = vsel %vm106_vm2, %v156_v13, %v155_v21  ;;  %v163_v31 = vld [vmem:[#allocation6 + $0xc] sm:$0x1]  ;;  %v164_v32 = vld [vmem:[#allocation6 + $0x14] sm:$0x1]  ;;  %v3289_v40 = vpack.c.bf16 %v578_v20, %v574_v19  ;;  %v3296_v50 = vpack.c.bf16 %v585_v23, %v581_v22 }
  0x5e   :  { %2153 = vmatmul.mubr.msk.f32.vlgmr.msra.gmra.mrb[0].mxu0 %vm85_vm0, %v226_v3  ;;  %2161 = vmatmul.mubr.msk.f32.vlgmr.msra.gmra.mrb[0].mxu1 %vm85_vm0, %v226_v3  ;;  %v227_v27 = vld [vmem:[#allocation4 + $0x8] sm:$0xff]  ;;  %v159_v30 = vsel %vm109_vm3, %v158_v14, %v157_v24  ;;  %v580_v33 = vld [vmem:[#allocation11 + $0xc0] sm:$0xff]  ;;  %v583_v34 = vld [vmem:[#allocation11 + $0xd8] sm:$0xff]  ;;  %v170_v37 = vrot.slane %v163_v31, 7  ;;  %v172_v38 = vrot.slane %v164_v32, 6 }
  0x5f   :  { %2257 = vmatpush1.bf16.msra.mxu0 %v3251_v55  ;;  %2289 = vmatpush1.bf16.msra.mxu1 %v3253_v56  ;;  %161 = vst.msk [vmem:[#allocation4 + $0x18] sm:$0xf] %vm112_vm4, %v159_v30  ;;  %v587_v35 = vld [vmem:[#allocation11 + $0xf8] sm:$0xff]  ;;  %v584_v41 = vld [vmem:[#allocation11 + $0xe0] sm:$0xff]  ;;  %v582_v42 = vld [vmem:[#allocation11 + $0xd0] sm:$0xff] }
  0x60   :  { %359 = vmatprep.mubr.f32.mxu0 %v3113_v0  ;;  %472 = vmatprep.mubr.f32.mxu1 %v3113_v0  ;;  %v165_v36 = vld [vmem:[#allocation6 + $0x1c] sm:$0x1]  ;;  %v586_v43 = vld [vmem:[#allocation11 + $0xf0] sm:$0xff]  ;;  %v589_v45 = vld [vmem:[#allocation11 + $0x108] sm:$0xff]  ;;  %v171_v47 = vsel %vm103_vm1, %v170_v37, %v162_v25  ;;  %v3298_v51 = vpack.c.bf16 %v587_v35, %v583_v34  ;;  %v3306_v62 = vpack.c.bf16 %v584_v41, %v580_v33 }
  0x61   :  { %2259 = vmatprep.subr.bf16.mxu0 %v3257_v4  ;;  %2291 = vmatprep.subr.bf16.mxu1 %v3259_v5  ;;  %v174_v44 = vrot.slane %v165_v36, 5  ;;  %v593_v46 = vld [vmem:[#allocation11 + $0x128] sm:$0xff]  ;;  %v591_v48 = vld [vmem:[#allocation11 + $0x118] sm:$0xff]  ;;  %v228_v49 = vld [vmem:[#allocation4 + $0x10] sm:$0xff]  ;;  %v173_v52 = vsel %vm106_vm2, %v172_v38, %v171_v47  ;;  %v3308_v63 = vpack.c.bf16 %v586_v43, %v582_v42 }
  0x62   :  { %2154 = vmatmul.mubr.msk.f32.gmra.mrb[2].mxu0 %vm85_vm0, %v227_v27  ;;  %2162 = vmatmul.mubr.msk.f32.gmra.mrb[2].mxu1 %vm85_vm0, %v227_v27  ;;  %v178_v53 = vld [vmem:[#allocation6 + $0x5] sm:$0x1]  ;;  %v179_v54 = vld [vmem:[#allocation6 + $0xd] sm:$0x1]  ;;  %v595_v58 = vld [vmem:[#allocation11 + $0x138] sm:$0xff]  ;;  %v3316_v11 = vpack.c.bf16 %v593_v46, %v589_v45 }
  0x63   :  { %2261 = vmatpush1.bf16.msra.mxu0 %v3267_v15  ;;  %2293 = vmatpush1.bf16.msra.mxu1 %v3269_v16  ;;  %v175_v57 = vsel %vm109_vm3, %v174_v44, %v173_v52  ;;  %v180_v59 = vld [vmem:[#allocation6 + $0x15] sm:$0x1]  ;;  %v181_v60 = vld [vmem:[#allocation6 + $0x1d] sm:$0x1]  ;;  %v186_v61 = vrot.slane %v179_v54, 7  ;;  %v588_v1 = vld [vmem:[#allocation11 + $0x100] sm:$0xff]  ;;  %v3318_v12 = vpack.c.bf16 %v595_v58, %v591_v48 }
  0x64   :  { %365 = vmatprep.mubr.f32.mxu0 %v3113_v0  ;;  %478 = vmatprep.mubr.f32.mxu1 %v3113_v0  ;;  %177 = vst.msk [vmem:[#allocation4 + $0x20] sm:$0xf] %vm112_vm4, %v175_v57  ;;  %v188_v2 = vrot.slane %v180_v59, 6  ;;  %v190_v3 = vrot.slane %v181_v60, 5  ;;  %v592_v6 = vld [vmem:[#allocation11 + $0x120] sm:$0xff]  ;;  %v590_v7 = vld [vmem:[#allocation11 + $0x110] sm:$0xff] }
  0x65   :  { %2263 = vmatprep.subr.bf16.mxu0 %v3277_v28  ;;  %2295 = vmatprep.subr.bf16.mxu1 %v3279_v29  ;;  %v594_v8 = vld [vmem:[#allocation11 + $0x130] sm:$0xff]  ;;  %v187_v9 = vsel %vm103_vm1, %v186_v61, %v178_v53  ;;  %v597_v13 = vld [vmem:[#allocation11 + $0x148] sm:$0xff]  ;;  %v194_v19 = vld [vmem:[#allocation6 + $0x6] sm:$0x1]  ;;  %v3329_v33 = vpack.c.bf16 %v592_v6, %v588_v1 }
  0x66   :  { %2155 = vmatmul.mubr.msk.f32.gmra.mrb[4].mxu0 %vm85_vm0, %v228_v49  ;;  %2163 = vmatmul.mubr.msk.f32.gmra.mrb[4].mxu1 %vm85_vm0, %v228_v49  ;;  %v229_v10 = vld [vmem:[#allocation4 + $0x18] sm:$0xff]  ;;  %v601_v14 = vld [vmem:[#allocation11 + $0x168] sm:$0xff]  ;;  %v189_v18 = vsel %vm106_vm2, %v188_v2, %v187_v9  ;;  %v196_v22 = vld [vmem:[#allocation6 + $0x16] sm:$0x1]  ;;  %v3331_v34 = vpack.c.bf16 %v594_v8, %v590_v7 }
  0x67   :  { %2265 = vmatpush1.bf16.msra.mxu0 %v3287_v39  ;;  %2297 = vmatpush1.bf16.msra.mxu1 %v3289_v40  ;;  %v191_v20 = vsel %vm109_vm3, %v190_v3, %v189_v18  ;;  %v195_v21 = vld [vmem:[#allocation6 + $0xe] sm:$0x1]  ;;  %v197_v23 = vld [vmem:[#allocation6 + $0x1e] sm:$0x1]  ;;  %v596_v24 = vld [vmem:[#allocation11 + $0x140] sm:$0xff]  ;;  %v204_v31 = vrot.slane %v196_v22, 6  ;;  %v3336_v45 = vpack.c.bf16 %v601_v14, %v597_v13 }
  0x68   :  { %371 = vmatprep.mubr.f32.mxu0 %v3113_v0  ;;  %484 = vmatprep.mubr.f32.mxu1 %v3113_v0  ;;  %193 = vst.msk [vmem:[#allocation4 + $0x28] sm:$0xf] %vm112_vm4, %v191_v20  ;;  %v599_v25 = vld [vmem:[#allocation11 + $0x158] sm:$0xff]  ;;  %v202_v30 = vrot.slane %v195_v21, 7  ;;  %v206_v32 = vrot.slane %v197_v23, 5  ;;  %v600_v35 = vld [vmem:[#allocation11 + $0x160] sm:$0xff] }
  0x69   :  { %2267 = vmatprep.subr.bf16.mxu0 %v3296_v50  ;;  %2299 = vmatprep.subr.bf16.mxu1 %v3298_v51  ;;  %v603_v27 = vld [vmem:[#allocation11 + $0x178] sm:$0xff]  ;;  %v598_v36 = vld [vmem:[#allocation11 + $0x150] sm:$0xff]  ;;  %v605_v38 = vld [vmem:[#allocation11 + $0x188] sm:$0xff]  ;;  %v3346_v60 = vpack.c.bf16 %v600_v35, %v596_v24 }
  0x6a   :  { %2156 = vmatmul.mubr.msk.f32.gmra.mrb[6].mxu0 %vm85_vm0, %v229_v10  ;;  %2164 = vmatmul.mubr.msk.f32.gmra.mrb[6].mxu1 %vm85_vm0, %v229_v10  ;;  %v602_v37 = vld [vmem:[#allocation11 + $0x170] sm:$0xff]  ;;  %v609_v41 = vld [vmem:[#allocation11 + $0x1a8] sm:$0xff]  ;;  %v203_v42 = vsel %vm103_vm1, %v202_v30, %v194_v19  ;;  %v210_v43 = vld [vmem:[#allocation6 + $0x7] sm:$0x1]  ;;  %v3338_v46 = vpack.c.bf16 %v603_v27, %v599_v25 }
  0x6b   :  { %2269 = vmatpush1.bf16.msra.mxu0 %v3306_v62  ;;  %2301 = vmatpush1.bf16.msra.mxu1 %v3308_v63  ;;  %v230_v44 = vld [vmem:[#allocation4 + $0x20] sm:$0xff]  ;;  %v205_v47 = vsel %vm106_vm2, %v204_v31, %v203_v42  ;;  %v211_v48 = vld [vmem:[#allocation6 + $0xf] sm:$0x1]  ;;  %v212_v49 = vld [vmem:[#allocation6 + $0x17] sm:$0x1]  ;;  %v3348_v61 = vpack.c.bf16 %v602_v37, %v598_v36  ;;  %v3356_v8 = vpack.c.bf16 %v609_v41, %v605_v38  ;;  %v244_v42 = vlaneseq }
  0x6c   :  { %377 = vmatprep.mubr.f32.mxu0 %v3113_v0  ;;  %490 = vmatprep.mubr.f32.mxu1 %v3113_v0  ;;  %v207_v52 = vsel %vm109_vm3, %v206_v32, %v205_v47  ;;  %v607_v53 = vld [vmem:[#allocation11 + $0x198] sm:$0xff]  ;;  %v218_v58 = vrot.slane %v211_v48, 7  ;;  %v220_v59 = vrot.slane %v212_v49, 6  ;;  %v604_v2 = vld [vmem:[#allocation11 + $0x180] sm:$0xff]  ;;  %v606_v10 = vld [vmem:[#allocation11 + $0x190] sm:$0xff] }
  0x6d   :  { %2271 = vmatprep.subr.bf16.mxu0 %v3316_v11  ;;  %2303 = vmatprep.subr.bf16.mxu1 %v3318_v12  ;;  %v611_v54 = vld [vmem:[#allocation11 + $0x1b8] sm:$0xff]  ;;  %209 = vst.msk [vmem:[#allocation4 + $0x30] sm:$0xf] %vm112_vm4, %v207_v52  ;;  %v608_v3 = vld [vmem:[#allocation11 + $0x1a0] sm:$0xff]  ;;  %v610_v13 = vld [vmem:[#allocation11 + $0x1b0] sm:$0xff] }
  0x6e   :  { %2157 = vmatmul.mubr.msk.f32.gmra.mrb[8].mxu0 %vm85_vm0, %v230_v44  ;;  %2165 = vmatmul.mubr.msk.f32.gmra.mrb[8].mxu1 %vm85_vm0, %v230_v44  ;;  %v213_v57 = vld [vmem:[#allocation6 + $0x1f] sm:$0x1]  ;;  %v219_v6 = vsel %vm103_vm1, %v218_v58, %v210_v43  ;;  %v3358_v9 = vpack.c.bf16 %v611_v54, %v607_v53  ;;  %v613_v18 = vld [vmem:[#allocation11 + $0x1c8] sm:$0xff]  ;;  %v3369_v23 = vpack.c.bf16 %v608_v3, %v604_v2  ;;  %v612_v25 = vld [vmem:[#allocation11 + $0x1c0] sm:$0xff]  ;;  %v245_v43 = vshrl.u32 %v244_v42, 7 }
  0x6f   :  { %2273 = vmatpush1.bf16.msra.mxu0 %v3329_v33  ;;  %2305 = vmatpush1.bf16.msra.mxu1 %v3331_v34  ;;  %v222_v1 = vrot.slane %v213_v57, 5  ;;  %v231_v7 = vld [vmem:[#allocation4 + $0x28] sm:$0xff]  ;;  %v221_v14 = vsel %vm106_vm2, %v220_v59, %v219_v6  ;;  %v615_v21 = vld [vmem:[#allocation11 + $0x1d8] sm:$0xff]  ;;  %v3371_v24 = vpack.c.bf16 %v610_v13, %v606_v10  ;;  %v616_v27 = vld [vmem:[#allocation11 + $0x1e0] sm:$0xff] }
  0x70   :  { %383 = vmatprep.mubr.f32.mxu0 %v3113_v0  ;;  %496 = vmatprep.mubr.f32.mxu1 %v3113_v0  ;;  %v617_v20 = vld [vmem:[#allocation11 + $0x1e8] sm:$0xff]  ;;  %v619_v22 = vld [vmem:[#allocation11 + $0x1f8] sm:$0xff]  ;;  %v614_v30 = vld [vmem:[#allocation11 + $0x1d0] sm:$0xff]  ;;  %v3383_v37 = vpack.c.bf16 %v616_v27, %v612_v25  ;;  %v246_v44 = vsub.s32 0, %v245_v43  ;;  %v250_v48 = vsub.s32 1, %v245_v43  ;;  %v258_v57 = vsub.s32 3, %v245_v43 }
  0x71   :  { %2275 = vmatprep.subr.bf16.mxu0 %v3336_v45  ;;  %2307 = vmatprep.subr.bf16.mxu1 %v3338_v46  ;;  %v223_v19 = vsel %vm109_vm3, %v222_v1, %v221_v14  ;;  %v618_v31 = vld [vmem:[#allocation11 + $0x1f0] sm:$0xff]  ;;  %v3375_v35 = vpack.c.bf16 %v617_v20, %v613_v18  ;;  %v3377_v36 = vpack.c.bf16 %v619_v22, %v615_v21  ;;  %v242_v47 = vld [vmem:[%s3725_s2] sm:$0xf]  ;;  %v254_v10 = vsub.s32 2, %v245_v43 }
  0x72   :  { %2158 = vmatmul.mubr.msk.f32.gmra.mrb[10].mxu0 %vm85_vm0, %v231_v7  ;;  %2166 = vmatmul.mubr.msk.f32.gmra.mrb[10].mxu1 %vm85_vm0, %v231_v7  ;;  %225 = vst.msk [vmem:[#allocation4 + $0x38] sm:$0xf] %vm112_vm4, %v223_v19  ;;  %v3385_v38 = vpack.c.bf16 %v618_v31, %v614_v30  ;;  %v3438_v49 = vrot.slane %v242_v47, %v246_v44 }
  0x73   :  { %2277 = vmatpush1.bf16.msra.mxu0 %v3346_v60  ;;  %2309 = vmatpush1.bf16.msra.mxu1 %v3348_v61  ;;  %v3440_v52 = vrot.slane %v242_v47, %v250_v48  ;;  %v3444_v7 = vrot.slane %v242_v47, %v258_v57  ;;  %v3447_v14 = vrot.slane %v242_v47, %v254_v10 }
  0x74   :  { %389 = vmatprep.mubr.f32.mxu0 %v3113_v0  ;;  %502 = vmatprep.mubr.f32.mxu1 %v3113_v0  ;;  %v232_v32 = vld [vmem:[#allocation4 + $0x30] sm:$0xff] }
  0x75   :  { %2279 = vmatprep.subr.bf16.mxu0 %v3356_v8  ;;  %2311 = vmatprep.subr.bf16.mxu1 %v3358_v9 }
  0x76   :  { %2159 = vmatmul.mubr.msk.f32.gmra.mrb[12].mxu0 %vm85_vm0, %v232_v32  ;;  %2167 = vmatmul.mubr.msk.f32.gmra.mrb[12].mxu1 %vm85_vm0, %v232_v32 }
  0x77   :  { %2281 = vmatpush1.bf16.msra.mxu0 %v3369_v23  ;;  %2313 = vmatpush1.bf16.msra.mxu1 %v3371_v24 }
  0x78   :  { %395 = vmatprep.mubr.f32.mxu0 %v3113_v0  ;;  %508 = vmatprep.mubr.f32.mxu1 %v3113_v0 }
  0x79   :  { %2283 = vmatprep.subr.bf16.mxu0 %v3375_v35  ;;  %v233_v41 = vld [vmem:[#allocation4 + $0x38] sm:$0xff]  ;;  %2315 = vmatprep.subr.bf16.mxu1 %v3377_v36 }
  0x7a   :  { %2160 = vmatmul.mubr.msk.f32.gmra.mrb[14].mxu0 %vm85_vm0, %v233_v41  ;;  %2168 = vmatmul.mubr.msk.f32.gmra.mrb[14].mxu1 %vm85_vm0, %v233_v41 }
  0x7b   :  { %2285 = vmatpush1.bf16.msra.mxu0 %v3383_v37  ;;  %2317 = vmatpush1.bf16.msra.mxu1 %v3385_v38 }
  0x7c   :  { %684 = vmatprep.mubr.f32.mxu0 %v3113_v0  ;;  %755 = vmatprep.mubr.f32.mxu1 %v3113_v0 }
  0x7d   :  { %2319 = vmatprep.subr.bf16.mxu0 %v3237_v17  ;;  %2351 = vmatprep.subr.bf16.mxu1 %v3241_v26 }
  0x7e   :  { %685 = vmatmul.mubr.f32.vlgmr.msra.gmra.mrb[0].mxu0 %v3113_v0  ;;  %756 = vmatmul.mubr.f32.vlgmr.msra.gmra.mrb[0].mxu1 %v3113_v0 }
  0x7f   :  { %2321 = vmatpush1.bf16.msra.mxu0 %v3251_v55  ;;  %2353 = vmatpush1.bf16.msra.mxu1 %v3253_v56 }
  0x80   :  { %2323 = vmatprep.subr.bf16.mxu0 %v3257_v4  ;;  %2355 = vmatprep.subr.bf16.mxu1 %v3259_v5 }
  0x81   :  { %861 = vmatprep.mubr.f32.mxu0 %v3113_v0  ;;  %932 = vmatprep.mubr.f32.mxu1 %v3113_v0 }
  0x83   :  { %2325 = vmatpush1.bf16.msra.mxu0 %v3267_v15  ;;  %2357 = vmatpush1.bf16.msra.mxu1 %v3269_v16 }
  0x84   :  { %2327 = vmatprep.subr.bf16.mxu0 %v3277_v28  ;;  %2359 = vmatprep.subr.bf16.mxu1 %v3279_v29 }
  0x87   :  { %2329 = vmatpush1.bf16.msra.mxu0 %v3287_v39  ;;  %2361 = vmatpush1.bf16.msra.mxu1 %v3289_v40 }
  0x88   :  { %2331 = vmatprep.subr.bf16.mxu0 %v3296_v50  ;;  %2363 = vmatprep.subr.bf16.mxu1 %v3298_v51 }
  0x8b   :  { %2333 = vmatpush1.bf16.msra.mxu0 %v3306_v62  ;;  %2365 = vmatpush1.bf16.msra.mxu1 %v3308_v63 }
  0x8c   :  { %2335 = vmatprep.subr.bf16.mxu0 %v3316_v11  ;;  %2367 = vmatprep.subr.bf16.mxu1 %v3318_v12 }
  0x8f   :  { %2337 = vmatpush1.bf16.msra.mxu0 %v3329_v33  ;;  %2369 = vmatpush1.bf16.msra.mxu1 %v3331_v34 }
  0x90   :  { %2339 = vmatprep.subr.bf16.mxu0 %v3336_v45  ;;  %2371 = vmatprep.subr.bf16.mxu1 %v3338_v46 }
  0x93   :  { %2341 = vmatpush1.bf16.msra.mxu0 %v3346_v60  ;;  %2373 = vmatpush1.bf16.msra.mxu1 %v3348_v61 }
  0x94   :  { %2343 = vmatprep.subr.bf16.mxu0 %v3356_v8  ;;  %2375 = vmatprep.subr.bf16.mxu1 %v3358_v9 }
  0x97   :  { %2345 = vmatpush1.bf16.msra.mxu0 %v3369_v23  ;;  %2377 = vmatpush1.bf16.msra.mxu1 %v3371_v24 }
  0x98   :  { %2347 = vmatprep.subr.bf16.mxu0 %v3375_v35  ;;  %2379 = vmatprep.subr.bf16.mxu1 %v3377_v36 }
  0x9b   :  { %2349 = vmatpush1.bf16.msra.mxu0 %v3383_v37  ;;  %2381 = vmatpush1.bf16.msra.mxu1 %v3385_v38 }
  0x9c   :  { %2383 = vmatprep.subr.bf16.mxu0 %v3237_v17  ;;  %2415 = vmatprep.subr.bf16.mxu1 %v3241_v26 }
 0x151   :  { %v686_v53 = vpop.f32.mrb[0].mxu0  ;;  %v757_v54 = vpop.f32.mrb[0].mxu1 }
 0x152   :  { %v2790_v58 = vadd.f32 %v686_v53, %v3438_v49  ;;  %v688_v59 = vpop.f32.mrb[1].mxu0  ;;  %v759_v1 = vpop.f32.mrb[1].mxu1  ;;  %v2806_v19 = vadd.f32 %v757_v54, %v3447_v14 }
 0x153   :  { %v2791_v2 = vadd.f32 %v688_v59, %v3440_v52  ;;  %v2807_v13 = vadd.f32 %v759_v1, %v3444_v7 }
 0x154   :  { %v2169_v3 = vmul.f32 -1.442695, %v2790_v58 }
 0x155   :  { %v2170_v6 = vmul.f32 -1.442695, %v2791_v2  ;;  %v2171_v18 = vmul.f32 -1.442695, %v2807_v13 }
 0x156   :  { %2865 = vpow2.f32 %v2169_v3 }
 0x157   :  { %2867 = vpow2.f32 %v2170_v6 }
 0x158   :  { %2869 = vpow2.f32 %v2171_v18 }
 0x159   :  { %2871 = vtanh.f32 %v2806_v19 }
 0x160   :  { %v2866_v20 = vpop.eup %2865 }
 0x161   :  { %v2868_v21 = vpop.eup %2867  ;;  %v769_v22 = vadd.f32 1.0, %v2866_v20 }
 0x162   :  { %v775_v25 = vadd.f32 1.0, %v2868_v21  ;;  %v2870_v27 = vpop.eup %2869 }
 0x163   :  { %2873 = vrcp.f32 %v769_v22  ;;  %v2872_v30 = vpop.eup %2871  ;;  %v782_v42 = vadd.f32 1.0, %v2870_v27 }
 0x164   :  { %2875 = vrcp.f32 %v775_v25 }
 0x165   :  { %2877 = vrcp.f32 %v782_v42 }
 0x16d   :  { %v2874_v31 = vpop.eup %2873 }
 0x16e   :  { %v2876_v32 = vpop.eup %2875  ;;  %v786_v41 = vmul.f32 %v2874_v31, %v2872_v30 }
 0x16f   :  { %v785_v43 = vmul.f32 0.0, %v2876_v32  ;;  %v2878_v47 = vpop.eup %2877 }
 0x171   :  { %v3450_v44 = vadd.f32 %v786_v41, %v785_v43 }
 0x173   :  { %2879 = vtanh.f32 %v3450_v44 }
 0x17d   :  { %v2880_v48 = vpop.eup %2879 }
 0x17e   :  { %v789_v53 = vmul.f32 %v2880_v48, %v2878_v47 }
 0x180   :  { %862 = vmatmul.mubr.f32.vlgmr.msra.gmra.mrb[2].mxu0 %v789_v53  ;;  %933 = vmatmul.mubr.f32.vlgmr.msra.gmra.mrb[2].mxu1 %v789_v53 }
 0x181   :  { %2385 = vmatpush1.bf16.msra.mxu0 %v3251_v55  ;;  %2417 = vmatpush1.bf16.msra.mxu1 %v3253_v56 }
 0x182   :  { %2387 = vmatprep.subr.bf16.mxu0 %v3257_v4  ;;  %2419 = vmatprep.subr.bf16.mxu1 %v3259_v5 }
 0x183   :  { %1038 = vmatprep.mubr.f32.mxu0 %v3113_v0  ;;  %1109 = vmatprep.mubr.f32.mxu1 %v3113_v0 }
 0x185   :  { %2389 = vmatpush1.bf16.msra.mxu0 %v3267_v15  ;;  %2421 = vmatpush1.bf16.msra.mxu1 %v3269_v16 }
 0x186   :  { %2391 = vmatprep.subr.bf16.mxu0 %v3277_v28  ;;  %2423 = vmatprep.subr.bf16.mxu1 %v3279_v29 }
 0x189   :  { %2393 = vmatpush1.bf16.msra.mxu0 %v3287_v39  ;;  %2425 = vmatpush1.bf16.msra.mxu1 %v3289_v40 }
 0x18a   :  { %2395 = vmatprep.subr.bf16.mxu0 %v3296_v50  ;;  %2427 = vmatprep.subr.bf16.mxu1 %v3298_v51 }
 0x18d   :  { %2397 = vmatpush1.bf16.msra.mxu0 %v3306_v62  ;;  %2429 = vmatpush1.bf16.msra.mxu1 %v3308_v63 }
 0x18e   :  { %2399 = vmatprep.subr.bf16.mxu0 %v3316_v11  ;;  %2431 = vmatprep.subr.bf16.mxu1 %v3318_v12 }
 0x191   :  { %2401 = vmatpush1.bf16.msra.mxu0 %v3329_v33  ;;  %2433 = vmatpush1.bf16.msra.mxu1 %v3331_v34 }
 0x192   :  { %2403 = vmatprep.subr.bf16.mxu0 %v3336_v45  ;;  %2435 = vmatprep.subr.bf16.mxu1 %v3338_v46 }
 0x195   :  { %2405 = vmatpush1.bf16.msra.mxu0 %v3346_v60  ;;  %2437 = vmatpush1.bf16.msra.mxu1 %v3348_v61 }
 0x196   :  { %2407 = vmatprep.subr.bf16.mxu0 %v3356_v8  ;;  %2439 = vmatprep.subr.bf16.mxu1 %v3358_v9 }
 0x199   :  { %2409 = vmatpush1.bf16.msra.mxu0 %v3369_v23  ;;  %2441 = vmatpush1.bf16.msra.mxu1 %v3371_v24 }
 0x19a   :  { %2411 = vmatprep.subr.bf16.mxu0 %v3375_v35  ;;  %2443 = vmatprep.subr.bf16.mxu1 %v3377_v36 }
 0x19d   :  { %2413 = vmatpush1.bf16.msra.mxu0 %v3383_v37  ;;  %2445 = vmatpush1.bf16.msra.mxu1 %v3385_v38 }
 0x19e   :  { %2447 = vmatprep.subr.bf16.mxu0 %v3237_v17  ;;  %2479 = vmatprep.subr.bf16.mxu1 %v3241_v26 }
 0x253   :  { %v863_v54 = vpop.f32.mrb[2].mxu0  ;;  %v934_v57 = vpop.f32.mrb[2].mxu1 }
 0x254   :  { %v2792_v58 = vadd.f32 %v863_v54, %v3438_v49  ;;  %v865_v59 = vpop.f32.mrb[3].mxu0  ;;  %v936_v1 = vpop.f32.mrb[3].mxu1  ;;  %v2808_v18 = vadd.f32 %v934_v57, %v3447_v14 }
 0x255   :  { %v2793_v2 = vadd.f32 %v865_v59, %v3440_v52  ;;  %v2809_v10 = vadd.f32 %v936_v1, %v3444_v7 }
 0x256   :  { %v2172_v3 = vmul.f32 -1.442695, %v2792_v58 }
 0x257   :  { %v2173_v6 = vmul.f32 -1.442695, %v2793_v2  ;;  %v2174_v13 = vmul.f32 -1.442695, %v2809_v10 }
 0x258   :  { %2881 = vpow2.f32 %v2172_v3 }
 0x259   :  { %2883 = vpow2.f32 %v2173_v6 }
 0x25a   :  { %2885 = vpow2.f32 %v2174_v13 }
 0x25b   :  { %2887 = vtanh.f32 %v2808_v18 }
 0x262   :  { %v2882_v19 = vpop.eup %2881 }
 0x263   :  { %v2884_v20 = vpop.eup %2883  ;;  %v946_v21 = vadd.f32 1.0, %v2882_v19 }
 0x264   :  { %v952_v22 = vadd.f32 1.0, %v2884_v20  ;;  %v2886_v25 = vpop.eup %2885 }
 0x265   :  { %2889 = vrcp.f32 %v946_v21  ;;  %v2888_v27 = vpop.eup %2887  ;;  %v959_v41 = vadd.f32 1.0, %v2886_v25 }
 0x266   :  { %2891 = vrcp.f32 %v952_v22 }
 0x267   :  { %2893 = vrcp.f32 %v959_v41 }
 0x26f   :  { %v2890_v30 = vpop.eup %2889 }
 0x270   :  { %v2892_v31 = vpop.eup %2891  ;;  %v963_v32 = vmul.f32 %v2890_v30, %v2888_v27 }
 0x271   :  { %v962_v42 = vmul.f32 %v2892_v31, %v3450_v44  ;;  %v2894_v47 = vpop.eup %2893 }
 0x273   :  { %v3492_v43 = vadd.f32 %v963_v32, %v962_v42 }
 0x275   :  { %2895 = vtanh.f32 %v3492_v43 }
 0x27f   :  { %v2896_v48 = vpop.eup %2895 }
 0x280   :  { %v966_v53 = vmul.f32 %v2896_v48, %v2894_v47 }
 0x282   :  { %1039 = vmatmul.mubr.f32.vlgmr.msra.gmra.mrb[4].mxu0 %v966_v53  ;;  %1110 = vmatmul.mubr.f32.vlgmr.msra.gmra.mrb[4].mxu1 %v966_v53 }
 0x283   :  { %2449 = vmatpush1.bf16.msra.mxu0 %v3251_v55  ;;  %2481 = vmatpush1.bf16.msra.mxu1 %v3253_v56 }
 0x284   :  { %2451 = vmatprep.subr.bf16.mxu0 %v3257_v4  ;;  %2483 = vmatprep.subr.bf16.mxu1 %v3259_v5 }
 0x285   :  { %1215 = vmatprep.mubr.f32.mxu0 %v3113_v0  ;;  %1286 = vmatprep.mubr.f32.mxu1 %v3113_v0 }
 0x287   :  { %2453 = vmatpush1.bf16.msra.mxu0 %v3267_v15  ;;  %2485 = vmatpush1.bf16.msra.mxu1 %v3269_v16 }
 0x288   :  { %2455 = vmatprep.subr.bf16.mxu0 %v3277_v28  ;;  %2487 = vmatprep.subr.bf16.mxu1 %v3279_v29 }
 0x28b   :  { %2457 = vmatpush1.bf16.msra.mxu0 %v3287_v39  ;;  %2489 = vmatpush1.bf16.msra.mxu1 %v3289_v40 }
 0x28c   :  { %2459 = vmatprep.subr.bf16.mxu0 %v3296_v50  ;;  %2491 = vmatprep.subr.bf16.mxu1 %v3298_v51 }
 0x28f   :  { %2461 = vmatpush1.bf16.msra.mxu0 %v3306_v62  ;;  %2493 = vmatpush1.bf16.msra.mxu1 %v3308_v63 }
 0x290   :  { %2463 = vmatprep.subr.bf16.mxu0 %v3316_v11  ;;  %2495 = vmatprep.subr.bf16.mxu1 %v3318_v12 }
 0x293   :  { %2465 = vmatpush1.bf16.msra.mxu0 %v3329_v33  ;;  %2497 = vmatpush1.bf16.msra.mxu1 %v3331_v34 }
 0x294   :  { %2467 = vmatprep.subr.bf16.mxu0 %v3336_v45  ;;  %2499 = vmatprep.subr.bf16.mxu1 %v3338_v46 }
 0x297   :  { %2469 = vmatpush1.bf16.msra.mxu0 %v3346_v60  ;;  %2501 = vmatpush1.bf16.msra.mxu1 %v3348_v61 }
 0x298   :  { %2471 = vmatprep.subr.bf16.mxu0 %v3356_v8  ;;  %2503 = vmatprep.subr.bf16.mxu1 %v3358_v9 }
 0x29b   :  { %2473 = vmatpush1.bf16.msra.mxu0 %v3369_v23  ;;  %2505 = vmatpush1.bf16.msra.mxu1 %v3371_v24 }
 0x29c   :  { %2475 = vmatprep.subr.bf16.mxu0 %v3375_v35  ;;  %2507 = vmatprep.subr.bf16.mxu1 %v3377_v36 }
 0x29f   :  { %2477 = vmatpush1.bf16.msra.mxu0 %v3383_v37  ;;  %2509 = vmatpush1.bf16.msra.mxu1 %v3385_v38 }
 0x2a0   :  { %2511 = vmatprep.subr.bf16.mxu0 %v3237_v17  ;;  %2543 = vmatprep.subr.bf16.mxu1 %v3241_v26 }
 0x355   :  { %v1040_v44 = vpop.f32.mrb[4].mxu0  ;;  %v1111_v54 = vpop.f32.mrb[4].mxu1 }
 0x356   :  { %v2794_v57 = vadd.f32 %v1040_v44, %v3438_v49  ;;  %v1042_v58 = vpop.f32.mrb[5].mxu0  ;;  %v1113_v59 = vpop.f32.mrb[5].mxu1  ;;  %v2810_v13 = vadd.f32 %v1111_v54, %v3447_v14 }
 0x357   :  { %v2795_v1 = vadd.f32 %v1042_v58, %v3440_v52  ;;  %v2811_v6 = vadd.f32 %v1113_v59, %v3444_v7 }
 0x358   :  { %v2175_v2 = vmul.f32 -1.442695, %v2794_v57 }
 0x359   :  { %v2176_v3 = vmul.f32 -1.442695, %v2795_v1  ;;  %v2177_v10 = vmul.f32 -1.442695, %v2811_v6 }
 0x35a   :  { %2897 = vpow2.f32 %v2175_v2 }
 0x35b   :  { %2899 = vpow2.f32 %v2176_v3 }
 0x35c   :  { %2901 = vpow2.f32 %v2177_v10 }
 0x35d   :  { %2903 = vtanh.f32 %v2810_v13 }
 0x364   :  { %v2898_v18 = vpop.eup %2897 }
 0x365   :  { %v2900_v19 = vpop.eup %2899  ;;  %v1123_v20 = vadd.f32 1.0, %v2898_v18 }
 0x366   :  { %v1129_v21 = vadd.f32 1.0, %v2900_v19  ;;  %v2902_v22 = vpop.eup %2901 }
 0x367   :  { %2905 = vrcp.f32 %v1123_v20  ;;  %v2904_v25 = vpop.eup %2903  ;;  %v1136_v32 = vadd.f32 1.0, %v2902_v22 }
 0x368   :  { %2907 = vrcp.f32 %v1129_v21 }
 0x369   :  { %2909 = vrcp.f32 %v1136_v32 }
 0x371   :  { %v2906_v27 = vpop.eup %2905 }
 0x372   :  { %v2908_v30 = vpop.eup %2907  ;;  %v1140_v31 = vmul.f32 %v2906_v27, %v2904_v25 }
 0x373   :  { %v1139_v41 = vmul.f32 %v2908_v30, %v3492_v43  ;;  %v2910_v47 = vpop.eup %2909 }
 0x375   :  { %v3534_v42 = vadd.f32 %v1140_v31, %v1139_v41 }
 0x377   :  { %2911 = vtanh.f32 %v3534_v42 }
 0x381   :  { %v2912_v48 = vpop.eup %2911 }
 0x382   :  { %v1143_v53 = vmul.f32 %v2912_v48, %v2910_v47 }
 0x384   :  { %1216 = vmatmul.mubr.f32.vlgmr.msra.gmra.mrb[6].mxu0 %v1143_v53  ;;  %1287 = vmatmul.mubr.f32.vlgmr.msra.gmra.mrb[6].mxu1 %v1143_v53 }
 0x385   :  { %2513 = vmatpush1.bf16.msra.mxu0 %v3251_v55  ;;  %2545 = vmatpush1.bf16.msra.mxu1 %v3253_v56 }
 0x386   :  { %2515 = vmatprep.subr.bf16.mxu0 %v3257_v4  ;;  %2547 = vmatprep.subr.bf16.mxu1 %v3259_v5 }
 0x387   :  { %1392 = vmatprep.mubr.f32.mxu0 %v3113_v0  ;;  %1463 = vmatprep.mubr.f32.mxu1 %v3113_v0 }
 0x389   :  { %2517 = vmatpush1.bf16.msra.mxu0 %v3267_v15  ;;  %2549 = vmatpush1.bf16.msra.mxu1 %v3269_v16 }
 0x38a   :  { %2519 = vmatprep.subr.bf16.mxu0 %v3277_v28  ;;  %2551 = vmatprep.subr.bf16.mxu1 %v3279_v29 }
 0x38d   :  { %2521 = vmatpush1.bf16.msra.mxu0 %v3287_v39  ;;  %2553 = vmatpush1.bf16.msra.mxu1 %v3289_v40 }
 0x38e   :  { %2523 = vmatprep.subr.bf16.mxu0 %v3296_v50  ;;  %2555 = vmatprep.subr.bf16.mxu1 %v3298_v51 }
 0x391   :  { %2525 = vmatpush1.bf16.msra.mxu0 %v3306_v62  ;;  %2557 = vmatpush1.bf16.msra.mxu1 %v3308_v63 }
 0x392   :  { %2527 = vmatprep.subr.bf16.mxu0 %v3316_v11  ;;  %2559 = vmatprep.subr.bf16.mxu1 %v3318_v12 }
 0x395   :  { %2529 = vmatpush1.bf16.msra.mxu0 %v3329_v33  ;;  %2561 = vmatpush1.bf16.msra.mxu1 %v3331_v34 }
 0x396   :  { %2531 = vmatprep.subr.bf16.mxu0 %v3336_v45  ;;  %2563 = vmatprep.subr.bf16.mxu1 %v3338_v46 }
 0x399   :  { %2533 = vmatpush1.bf16.msra.mxu0 %v3346_v60  ;;  %2565 = vmatpush1.bf16.msra.mxu1 %v3348_v61 }
 0x39a   :  { %2535 = vmatprep.subr.bf16.mxu0 %v3356_v8  ;;  %2567 = vmatprep.subr.bf16.mxu1 %v3358_v9 }
 0x39d   :  { %2537 = vmatpush1.bf16.msra.mxu0 %v3369_v23  ;;  %2569 = vmatpush1.bf16.msra.mxu1 %v3371_v24 }
 0x39e   :  { %2539 = vmatprep.subr.bf16.mxu0 %v3375_v35  ;;  %2571 = vmatprep.subr.bf16.mxu1 %v3377_v36 }
 0x3a1   :  { %2541 = vmatpush1.bf16.msra.mxu0 %v3383_v37  ;;  %2573 = vmatpush1.bf16.msra.mxu1 %v3385_v38 }
 0x3a2   :  { %2575 = vmatprep.subr.bf16.mxu0 %v3237_v17  ;;  %2607 = vmatprep.subr.bf16.mxu1 %v3241_v26 }
 0x457   :  { %v1217_v43 = vpop.f32.mrb[6].mxu0  ;;  %v1288_v44 = vpop.f32.mrb[6].mxu1 }
 0x458   :  { %v2796_v54 = vadd.f32 %v1217_v43, %v3438_v49  ;;  %v1219_v57 = vpop.f32.mrb[7].mxu0  ;;  %v1290_v58 = vpop.f32.mrb[7].mxu1  ;;  %v2812_v10 = vadd.f32 %v1288_v44, %v3447_v14 }
 0x459   :  { %v2797_v59 = vadd.f32 %v1219_v57, %v3440_v52  ;;  %v2813_v3 = vadd.f32 %v1290_v58, %v3444_v7 }
 0x45a   :  { %v2178_v1 = vmul.f32 -1.442695, %v2796_v54 }
 0x45b   :  { %v2179_v2 = vmul.f32 -1.442695, %v2797_v59  ;;  %v2180_v6 = vmul.f32 -1.442695, %v2813_v3 }
 0x45c   :  { %2913 = vpow2.f32 %v2178_v1 }
 0x45d   :  { %2915 = vpow2.f32 %v2179_v2 }
 0x45e   :  { %2917 = vpow2.f32 %v2180_v6 }
 0x45f   :  { %2919 = vtanh.f32 %v2812_v10 }
 0x466   :  { %v2914_v13 = vpop.eup %2913 }
 0x467   :  { %v2916_v18 = vpop.eup %2915  ;;  %v1300_v19 = vadd.f32 1.0, %v2914_v13 }
 0x468   :  { %v1306_v20 = vadd.f32 1.0, %v2916_v18  ;;  %v2918_v21 = vpop.eup %2917 }
 0x469   :  { %2921 = vrcp.f32 %v1300_v19  ;;  %v2920_v22 = vpop.eup %2919  ;;  %v1313_v31 = vadd.f32 1.0, %v2918_v21 }
 0x46a   :  { %2923 = vrcp.f32 %v1306_v20 }
 0x46b   :  { %2925 = vrcp.f32 %v1313_v31 }
 0x473   :  { %v2922_v25 = vpop.eup %2921 }
 0x474   :  { %v2924_v27 = vpop.eup %2923  ;;  %v1317_v30 = vmul.f32 %v2922_v25, %v2920_v22 }
 0x475   :  { %v1316_v32 = vmul.f32 %v2924_v27, %v3534_v42  ;;  %v2926_v47 = vpop.eup %2925 }
 0x477   :  { %v3576_v41 = vadd.f32 %v1317_v30, %v1316_v32 }
 0x479   :  { %2927 = vtanh.f32 %v3576_v41 }
 0x483   :  { %v2928_v48 = vpop.eup %2927 }
 0x484   :  { %v1320_v53 = vmul.f32 %v2928_v48, %v2926_v47 }
 0x486   :  { %1393 = vmatmul.mubr.f32.vlgmr.msra.gmra.mrb[8].mxu0 %v1320_v53  ;;  %1464 = vmatmul.mubr.f32.vlgmr.msra.gmra.mrb[8].mxu1 %v1320_v53 }
 0x487   :  { %2577 = vmatpush1.bf16.msra.mxu0 %v3251_v55  ;;  %2609 = vmatpush1.bf16.msra.mxu1 %v3253_v56 }
 0x488   :  { %2579 = vmatprep.subr.bf16.mxu0 %v3257_v4  ;;  %2611 = vmatprep.subr.bf16.mxu1 %v3259_v5 }
 0x489   :  { %1569 = vmatprep.mubr.f32.mxu0 %v3113_v0  ;;  %1640 = vmatprep.mubr.f32.mxu1 %v3113_v0 }
 0x48b   :  { %2581 = vmatpush1.bf16.msra.mxu0 %v3267_v15  ;;  %2613 = vmatpush1.bf16.msra.mxu1 %v3269_v16 }
 0x48c   :  { %2583 = vmatprep.subr.bf16.mxu0 %v3277_v28  ;;  %2615 = vmatprep.subr.bf16.mxu1 %v3279_v29 }
 0x48f   :  { %2585 = vmatpush1.bf16.msra.mxu0 %v3287_v39  ;;  %2617 = vmatpush1.bf16.msra.mxu1 %v3289_v40 }
 0x490   :  { %2587 = vmatprep.subr.bf16.mxu0 %v3296_v50  ;;  %2619 = vmatprep.subr.bf16.mxu1 %v3298_v51 }
 0x493   :  { %2589 = vmatpush1.bf16.msra.mxu0 %v3306_v62  ;;  %2621 = vmatpush1.bf16.msra.mxu1 %v3308_v63 }
 0x494   :  { %2591 = vmatprep.subr.bf16.mxu0 %v3316_v11  ;;  %2623 = vmatprep.subr.bf16.mxu1 %v3318_v12 }
 0x497   :  { %2593 = vmatpush1.bf16.msra.mxu0 %v3329_v33  ;;  %2625 = vmatpush1.bf16.msra.mxu1 %v3331_v34 }
 0x498   :  { %2595 = vmatprep.subr.bf16.mxu0 %v3336_v45  ;;  %2627 = vmatprep.subr.bf16.mxu1 %v3338_v46 }
 0x49b   :  { %2597 = vmatpush1.bf16.msra.mxu0 %v3346_v60  ;;  %2629 = vmatpush1.bf16.msra.mxu1 %v3348_v61 }
 0x49c   :  { %2599 = vmatprep.subr.bf16.mxu0 %v3356_v8  ;;  %2631 = vmatprep.subr.bf16.mxu1 %v3358_v9 }
 0x49f   :  { %2601 = vmatpush1.bf16.msra.mxu0 %v3369_v23  ;;  %2633 = vmatpush1.bf16.msra.mxu1 %v3371_v24 }
 0x4a0   :  { %2603 = vmatprep.subr.bf16.mxu0 %v3375_v35  ;;  %2635 = vmatprep.subr.bf16.mxu1 %v3377_v36 }
 0x4a3   :  { %2605 = vmatpush1.bf16.msra.mxu0 %v3383_v37  ;;  %2637 = vmatpush1.bf16.msra.mxu1 %v3385_v38 }
 0x4a4   :  { %2639 = vmatprep.subr.bf16.mxu0 %v3237_v17  ;;  %2671 = vmatprep.subr.bf16.mxu1 %v3241_v26 }
 0x559   :  { %v1394_v42 = vpop.f32.mrb[8].mxu0  ;;  %v1465_v43 = vpop.f32.mrb[8].mxu1 }
 0x55a   :  { %v2798_v44 = vadd.f32 %v1394_v42, %v3438_v49  ;;  %v1396_v54 = vpop.f32.mrb[9].mxu0  ;;  %v1467_v57 = vpop.f32.mrb[9].mxu1  ;;  %v2814_v6 = vadd.f32 %v1465_v43, %v3447_v14 }
 0x55b   :  { %v2799_v58 = vadd.f32 %v1396_v54, %v3440_v52  ;;  %v2815_v2 = vadd.f32 %v1467_v57, %v3444_v7 }
 0x55c   :  { %v2181_v59 = vmul.f32 -1.442695, %v2798_v44 }
 0x55d   :  { %v2182_v1 = vmul.f32 -1.442695, %v2799_v58  ;;  %v2183_v3 = vmul.f32 -1.442695, %v2815_v2 }
 0x55e   :  { %2929 = vpow2.f32 %v2181_v59 }
 0x55f   :  { %2931 = vpow2.f32 %v2182_v1 }
 0x560   :  { %2933 = vpow2.f32 %v2183_v3 }
 0x561   :  { %2935 = vtanh.f32 %v2814_v6 }
 0x568   :  { %v2930_v10 = vpop.eup %2929 }
 0x569   :  { %v2932_v13 = vpop.eup %2931  ;;  %v1477_v18 = vadd.f32 1.0, %v2930_v10 }
 0x56a   :  { %v1483_v19 = vadd.f32 1.0, %v2932_v13  ;;  %v2934_v20 = vpop.eup %2933 }
 0x56b   :  { %2937 = vrcp.f32 %v1477_v18  ;;  %v2936_v21 = vpop.eup %2935  ;;  %v1490_v30 = vadd.f32 1.0, %v2934_v20 }
 0x56c   :  { %2939 = vrcp.f32 %v1483_v19 }
 0x56d   :  { %2941 = vrcp.f32 %v1490_v30 }
 0x575   :  { %v2938_v22 = vpop.eup %2937 }
 0x576   :  { %v2940_v25 = vpop.eup %2939  ;;  %v1494_v27 = vmul.f32 %v2938_v22, %v2936_v21 }
 0x577   :  { %v1493_v31 = vmul.f32 %v2940_v25, %v3576_v41  ;;  %v2942_v47 = vpop.eup %2941 }
 0x579   :  { %v3618_v32 = vadd.f32 %v1494_v27, %v1493_v31 }
 0x57b   :  { %2943 = vtanh.f32 %v3618_v32 }
 0x585   :  { %v2944_v48 = vpop.eup %2943 }
 0x586   :  { %v1497_v53 = vmul.f32 %v2944_v48, %v2942_v47 }
 0x588   :  { %1570 = vmatmul.mubr.f32.vlgmr.msra.gmra.mrb[10].mxu0 %v1497_v53  ;;  %1641 = vmatmul.mubr.f32.vlgmr.msra.gmra.mrb[10].mxu1 %v1497_v53  ;;  %v2039_v53 = vld [vmem:[#allocation12 + $0x20] sm:$0xff] }
 0x589   :  { %2641 = vmatpush1.bf16.msra.mxu0 %v3251_v55  ;;  %2673 = vmatpush1.bf16.msra.mxu1 %v3253_v56 }
 0x58a   :  { %2643 = vmatprep.subr.bf16.mxu0 %v3257_v4  ;;  %2675 = vmatprep.subr.bf16.mxu1 %v3259_v5 }
 0x58b   :  { %1746 = vmatprep.mubr.f32.mxu0 %v3113_v0  ;;  %1817 = vmatprep.mubr.f32.mxu1 %v3113_v0 }
 0x58d   :  { %2645 = vmatpush1.bf16.msra.mxu0 %v3267_v15  ;;  %2677 = vmatpush1.bf16.msra.mxu1 %v3269_v16 }
 0x58e   :  { %2647 = vmatprep.subr.bf16.mxu0 %v3277_v28  ;;  %2679 = vmatprep.subr.bf16.mxu1 %v3279_v29 }
 0x591   :  { %2649 = vmatpush1.bf16.msra.mxu0 %v3287_v39  ;;  %2681 = vmatpush1.bf16.msra.mxu1 %v3289_v40 }
 0x592   :  { %2651 = vmatprep.subr.bf16.mxu0 %v3296_v50  ;;  %2683 = vmatprep.subr.bf16.mxu1 %v3298_v51 }
 0x595   :  { %2653 = vmatpush1.bf16.msra.mxu0 %v3306_v62  ;;  %2685 = vmatpush1.bf16.msra.mxu1 %v3308_v63 }
 0x596   :  { %2655 = vmatprep.subr.bf16.mxu0 %v3316_v11  ;;  %2687 = vmatprep.subr.bf16.mxu1 %v3318_v12 }
 0x599   :  { %2657 = vmatpush1.bf16.msra.mxu0 %v3329_v33  ;;  %2689 = vmatpush1.bf16.msra.mxu1 %v3331_v34 }
 0x59a   :  { %2659 = vmatprep.subr.bf16.mxu0 %v3336_v45  ;;  %2691 = vmatprep.subr.bf16.mxu1 %v3338_v46 }
 0x59d   :  { %2661 = vmatpush1.bf16.msra.mxu0 %v3346_v60  ;;  %2693 = vmatpush1.bf16.msra.mxu1 %v3348_v61 }
 0x59e   :  { %2663 = vmatprep.subr.bf16.mxu0 %v3356_v8  ;;  %2695 = vmatprep.subr.bf16.mxu1 %v3358_v9 }
 0x5a1   :  { %2665 = vmatpush1.bf16.msra.mxu0 %v3369_v23  ;;  %2697 = vmatpush1.bf16.msra.mxu1 %v3371_v24 }
 0x5a2   :  { %2667 = vmatprep.subr.bf16.mxu0 %v3375_v35  ;;  %2699 = vmatprep.subr.bf16.mxu1 %v3377_v36 }
 0x5a5   :  { %2669 = vmatpush1.bf16.msra.mxu0 %v3383_v37  ;;  %2701 = vmatpush1.bf16.msra.mxu1 %v3385_v38 }
 0x5a6   :  { %2703 = vmatprep.subr.bf16.mxu0 %v3237_v17  ;;  %2735 = vmatprep.subr.bf16.mxu1 %v3241_v26 }
 0x65b   :  { %v1571_v41 = vpop.f32.mrb[10].mxu0  ;;  %v1642_v42 = vpop.f32.mrb[10].mxu1 }
 0x65c   :  { %v2800_v43 = vadd.f32 %v1571_v41, %v3438_v49  ;;  %v1573_v44 = vpop.f32.mrb[11].mxu0  ;;  %v1644_v54 = vpop.f32.mrb[11].mxu1  ;;  %v2816_v3 = vadd.f32 %v1642_v42, %v3447_v14  ;;  %v2040_v41 = vld [vmem:[#allocation12 + $0x28] sm:$0xff] }
 0x65d   :  { %v2801_v57 = vadd.f32 %v1573_v44, %v3440_v52  ;;  %v2817_v1 = vadd.f32 %v1644_v54, %v3444_v7  ;;  %v2773_v42 = vpack.c.bf16 %v2040_v41, %v2039_v53  ;;  %v2042_v44 = vld [vmem:[#allocation12 + $0x38] sm:$0xff] }
 0x65e   :  { %v2184_v58 = vmul.f32 -1.442695, %v2800_v43  ;;  %v2041_v43 = vld [vmem:[#allocation12 + $0x30] sm:$0xff] }
 0x65f   :  { %v2185_v59 = vmul.f32 -1.442695, %v2801_v57  ;;  %v2186_v2 = vmul.f32 -1.442695, %v2817_v1  ;;  %v2776_v54 = vpack.c.bf16 %v2042_v44, %v2041_v43  ;;  %v2043_v57 = vld [vmem:[#allocation12 + $0x40] sm:$0xff]  ;;  %v2045_v1 = vld [vmem:[#allocation12 + $0x50] sm:$0xff] }
 0x660   :  { %2945 = vpow2.f32 %v2184_v58  ;;  %v2044_v58 = vld [vmem:[#allocation12 + $0x48] sm:$0xff] }
 0x661   :  { %2947 = vpow2.f32 %v2185_v59  ;;  %v2779_v59 = vpack.c.bf16 %v2044_v58, %v2043_v57 }
 0x662   :  { %2949 = vpow2.f32 %v2186_v2  ;;  %v2046_v2 = vld [vmem:[#allocation12 + $0x58] sm:$0xff] }
 0x663   :  { %2951 = vtanh.f32 %v2816_v3  ;;  %v2782_v3 = vpack.c.bf16 %v2046_v2, %v2045_v1 }
 0x66a   :  { %v2946_v17 = vpop.eup %2945 }
 0x66b   :  { %v2948_v6 = vpop.eup %2947  ;;  %v1654_v26 = vadd.f32 1.0, %v2946_v17  ;;  %v2047_v17 = vld [vmem:[#allocation12 + $0x60] sm:$0xff] }
 0x66c   :  { %v1660_v10 = vadd.f32 1.0, %v2948_v6  ;;  %v2950_v13 = vpop.eup %2949  ;;  %v2048_v6 = vld [vmem:[#allocation12 + $0x68] sm:$0xff] }
 0x66d   :  { %2953 = vrcp.f32 %v1654_v26  ;;  %v2952_v18 = vpop.eup %2951  ;;  %v1667_v22 = vadd.f32 1.0, %v2950_v13  ;;  %v2785_v26 = vpack.c.bf16 %v2048_v6, %v2047_v17  ;;  %v2050_v13 = vld [vmem:[#allocation12 + $0x78] sm:$0xff] }
 0x66e   :  { %2955 = vrcp.f32 %v1660_v10  ;;  %v2049_v10 = vld [vmem:[#allocation12 + $0x70] sm:$0xff] }
 0x66f   :  { %2957 = vrcp.f32 %v1667_v22 }
 0x677   :  { %v2954_v19 = vpop.eup %2953 }
 0x678   :  { %v2956_v20 = vpop.eup %2955  ;;  %v1671_v21 = vmul.f32 %v2954_v19, %v2952_v18  ;;  %v2788_v18 = vpack.c.bf16 %v2050_v13, %v2049_v10 }
 0x679   :  { %v1670_v25 = vmul.f32 %v2956_v20, %v3618_v32  ;;  %v2958_v30 = vpop.eup %2957  ;;  %v2038_v32 = vld [vmem:[#allocation12 + $0x18] sm:$0xff] }
 0x67b   :  { %v3660_v27 = vadd.f32 %v1671_v21, %v1670_v25 }
 0x67d   :  { %2959 = vtanh.f32 %v3660_v27 }
 0x687   :  { %v2960_v31 = vpop.eup %2959 }
 0x688   :  { %v1674_v47 = vmul.f32 %v2960_v31, %v2958_v30 }
 0x68a   :  { %1747 = vmatmul.mubr.f32.vlgmr.msra.gmra.mrb[12].mxu0 %v1674_v47  ;;  %1818 = vmatmul.mubr.f32.vlgmr.msra.gmra.mrb[12].mxu1 %v1674_v47 }
 0x68b   :  { %2705 = vmatpush1.bf16.msra.mxu0 %v3251_v55  ;;  %2737 = vmatpush1.bf16.msra.mxu1 %v3253_v56 }
 0x68c   :  { %2707 = vmatprep.subr.bf16.mxu0 %v3257_v4  ;;  %2739 = vmatprep.subr.bf16.mxu1 %v3259_v5 }
 0x68d   :  { %1923 = vmatprep.mubr.f32.mxu0 %v3113_v0  ;;  %1994 = vmatprep.mubr.f32.mxu1 %v3113_v0 }
 0x68f   :  { %2709 = vmatpush1.bf16.msra.mxu0 %v3267_v15  ;;  %2741 = vmatpush1.bf16.msra.mxu1 %v3269_v16 }
 0x690   :  { %2711 = vmatprep.subr.bf16.mxu0 %v3277_v28  ;;  %2743 = vmatprep.subr.bf16.mxu1 %v3279_v29 }
 0x693   :  { %2713 = vmatpush1.bf16.msra.mxu0 %v3287_v39  ;;  %2745 = vmatpush1.bf16.msra.mxu1 %v3289_v40 }
 0x694   :  { %2715 = vmatprep.subr.bf16.mxu0 %v3296_v50  ;;  %2747 = vmatprep.subr.bf16.mxu1 %v3298_v51 }
 0x697   :  { %2717 = vmatpush1.bf16.msra.mxu0 %v3306_v62  ;;  %2749 = vmatpush1.bf16.msra.mxu1 %v3308_v63 }
 0x698   :  { %2719 = vmatprep.subr.bf16.mxu0 %v3316_v11  ;;  %2751 = vmatprep.subr.bf16.mxu1 %v3318_v12 }
 0x69b   :  { %2721 = vmatpush1.bf16.msra.mxu0 %v3329_v33  ;;  %2753 = vmatpush1.bf16.msra.mxu1 %v3331_v34 }
 0x69c   :  { %2723 = vmatprep.subr.bf16.mxu0 %v3336_v45  ;;  %2755 = vmatprep.subr.bf16.mxu1 %v3338_v46 }
 0x69f   :  { %2725 = vmatpush1.bf16.msra.mxu0 %v3346_v60  ;;  %2757 = vmatpush1.bf16.msra.mxu1 %v3348_v61 }
 0x6a0   :  { %2727 = vmatprep.subr.bf16.mxu0 %v3356_v8  ;;  %2759 = vmatprep.subr.bf16.mxu1 %v3358_v9 }
 0x6a3   :  { %2729 = vmatpush1.bf16.msra.mxu0 %v3369_v23  ;;  %2761 = vmatpush1.bf16.msra.mxu1 %v3371_v24 }
 0x6a4   :  { %2731 = vmatprep.subr.bf16.mxu0 %v3375_v35  ;;  %2763 = vmatprep.subr.bf16.mxu1 %v3377_v36  ;;  %v2035_v35 = vld [vmem:[#allocation12] sm:$0xff]  ;;  %v2036_v36 = vld [vmem:[#allocation12 + $0x8] sm:$0xff] }
 0x6a7   :  { %2733 = vmatpush1.bf16.msra.mxu0 %v3383_v37  ;;  %2765 = vmatpush1.bf16.msra.mxu1 %v3385_v38  ;;  %v2767_v37 = vpack.c.bf16 %v2036_v36, %v2035_v35  ;;  %v3114_v38 = vmov 0.0|0.0  }
 0x6a8   :  { %2766 = vmatprep.subr.bf16.mxu0 %v3114_v38 }
 0x75d   :  { %v1748_v55 = vpop.f32.mrb[12].mxu0  ;;  %v1819_v56 = vpop.f32.mrb[12].mxu1 }
 0x75e   :  { %v2802_v4 = vadd.f32 %v1748_v55, %v3438_v49  ;;  %v1750_v5 = vpop.f32.mrb[13].mxu0  ;;  %v1821_v15 = vpop.f32.mrb[13].mxu1  ;;  %v2818_v50 = vadd.f32 %v1819_v56, %v3447_v14 }
 0x75f   :  { %v2803_v16 = vadd.f32 %v1750_v5, %v3440_v52  ;;  %v2819_v39 = vadd.f32 %v1821_v15, %v3444_v7  ;;  %v2037_v7 = vld [vmem:[#allocation12 + $0x10] sm:$0xff] }
 0x760   :  { %v2187_v28 = vmul.f32 -1.442695, %v2802_v4  ;;  %v2770_v48 = vpack.c.bf16 %v2038_v32, %v2037_v7 }
 0x761   :  { %v2188_v29 = vmul.f32 -1.442695, %v2803_v16  ;;  %v2189_v40 = vmul.f32 -1.442695, %v2819_v39 }
 0x762   :  { %2961 = vpow2.f32 %v2187_v28 }
 0x763   :  { %2963 = vpow2.f32 %v2188_v29  ;;  %v2193_v29 = vld [vmem:[%s3728_s5] ss:$0 sm:$0xff] }
 0x764   :  { %2965 = vpow2.f32 %v2189_v40 }
 0x765   :  { %2967 = vtanh.f32 %v2818_v50 }
 0x76c   :  { %v2962_v51 = vpop.eup %2961 }
 0x76d   :  { %v2964_v62 = vpop.eup %2963  ;;  %v1831_v63 = vadd.f32 1.0, %v2962_v51 }
 0x76e   :  { %v1837_v11 = vadd.f32 1.0, %v2964_v62  ;;  %v2966_v12 = vpop.eup %2965 }
 0x76f   :  { %2969 = vrcp.f32 %v1831_v63  ;;  %v2968_v33 = vpop.eup %2967  ;;  %v1844_v60 = vadd.f32 1.0, %v2966_v12 }
 0x770   :  { %2971 = vrcp.f32 %v1837_v11 }
 0x771   :  { %2973 = vrcp.f32 %v1844_v60 }
 0x779   :  { %v2970_v34 = vpop.eup %2969 }
 0x77a   :  { %v2972_v45 = vpop.eup %2971  ;;  %v1848_v46 = vmul.f32 %v2970_v34, %v2968_v33 }
 0x77b   :  { %v1847_v61 = vmul.f32 %v2972_v45, %v3660_v27  ;;  %v2974_v9 = vpop.eup %2973 }
 0x77d   :  { %v3700_v8 = vadd.f32 %v1848_v46, %v1847_v61 }
 0x77f   :  { %2975 = vtanh.f32 %v3700_v8 }
 0x789   :  { %v2976_v23 = vpop.eup %2975 }
 0x78a   :  { %v1851_v24 = vmul.f32 %v2976_v23, %v2974_v9 }
 0x78c   :  { %1924 = vmatmul.mubr.f32.vlgmr.msra.gmra.mrb[14].mxu0 %v1851_v24  ;;  %1995 = vmatmul.mubr.f32.vlgmr.msra.gmra.mrb[14].mxu1 %v1851_v24 }
 0x78d   :  { %2768 = vmatpush3.bf16.msra.mxu0 %v2767_v37  ;;  %2243 = vmatprep.mubr.msk.f32.mxu0 %vm3115_vm5, %v3113_v0 }
 0x78e   :  { %2769 = vmatprep.subr.bf16.mxu0 %v3114_v38 }
 0x791   :  { %2771 = vmatpush3.bf16.msra.mxu0 %v2770_v48 }
 0x792   :  { %2772 = vmatprep.subr.bf16.mxu0 %v3114_v38 }
 0x795   :  { %2774 = vmatpush3.bf16.msra.mxu0 %v2773_v42 }
 0x796   :  { %2775 = vmatprep.subr.bf16.mxu0 %v3114_v38 }
 0x799   :  { %2777 = vmatpush3.bf16.msra.mxu0 %v2776_v54 }
 0x79a   :  { %2778 = vmatprep.subr.bf16.mxu0 %v3114_v38 }
 0x79d   :  { %2780 = vmatpush3.bf16.msra.mxu0 %v2779_v59 }
 0x79e   :  { %2781 = vmatprep.subr.bf16.mxu0 %v3114_v38 }
 0x7a1   :  { %2783 = vmatpush3.bf16.msra.mxu0 %v2782_v3 }
 0x7a2   :  { %2784 = vmatprep.subr.bf16.mxu0 %v3114_v38 }
 0x7a5   :  { %2786 = vmatpush3.bf16.msra.mxu0 %v2785_v26 }
 0x7a6   :  { %2787 = vmatprep.subr.bf16.mxu0 %v3114_v38 }
 0x7a9   :  { %2789 = vmatpush3.bf16.msra.mxu0 %v2788_v18 }
 0x85f   :  { %v1925_v19 = vpop.f32.mrb[14].mxu0  ;;  %v1996_v20 = vpop.f32.mrb[14].mxu1 }
 0x860   :  { %v2804_v21 = vadd.f32 %v1925_v19, %v3438_v49  ;;  %v1927_v22 = vpop.f32.mrb[15].mxu0  ;;  %v1998_v25 = vpop.f32.mrb[15].mxu1  ;;  %v2820_v31 = vadd.f32 %v1996_v20, %v3447_v14 }
 0x861   :  { %v2805_v0 = vadd.f32 %v1927_v22, %v3440_v52 }
 0x862   :  { %v2190_v27 = vmul.f32 -1.442695, %v2804_v21 }
 0x863   :  { %v2191_v30 = vmul.f32 -1.442695, %v2805_v0 }
 0x864   :  { %2977 = vpow2.f32 %v2190_v27 }
 0x865   :  { %2979 = vpow2.f32 %v2191_v30 }
 0x866   :  { %2981 = vtanh.f32 %v2820_v31 }
 0x86e   :  { %v2978_v47 = vpop.eup %2977 }
 0x86f   :  { %v2980_v55 = vpop.eup %2979  ;;  %v2008_v56 = vadd.f32 1.0, %v2978_v47 }
 0x870   :  { %v2014_v4 = vadd.f32 1.0, %v2980_v55  ;;  %v2982_v5 = vpop.eup %2981 }
 0x871   :  { %2983 = vrcp.f32 %v2008_v56 }
 0x872   :  { %2985 = vrcp.f32 %v2014_v4 }
 0x87b   :  { %v2984_v15 = vpop.eup %2983 }
 0x87c   :  { %v2986_v49 = vpop.eup %2985  ;;  %v2025_v16 = vmul.f32 %v2984_v15, %v2982_v5 }
 0x87d   :  { %v2024_v28 = vmul.f32 %v2986_v49, %v3700_v8 }
 0x87f   :  { %v2026_v52 = vadd.f32 %v2025_v16, %v2024_v28 }
 0x881   :  { %2244 = vmatmul.mubr.f32.vlgmr.msra.gmra.mrb[16].mxu0 %v2026_v52 }
 0x954   :  { %v2124_v14 = vpop.f32.mrb[16].mxu0 }
 0x955   :  { %v2125_v39 = vadd.f32 %v2193_v29, %v2124_v14  ;;  %v2245_v40 = vpop.f32.mrb[17].mxu0 }
 0x957   :  { %2128 = vst [vmem:[#allocation14] sm:$0xf] %v2125_v39 }
 0x958   :  { %3086 = shalt.err (!%p3083_p8)
}
 0x959   :  { %s3087_s28 = scalar_lea.hbm %s3729_s6, 64 }
 0x95a   :  { %p3088_p9 = scmp.ne.s32.totalorder %s3729_s6, %s3087_s28  ;;  %p3091_p10 = scmp.lt.u32.totalorder %s3087_s28, %s3729_s6 }
 0x95c   :  { %p3093_p11 = pnand %p3091_p10, %p3088_p9 }
 0x95e   :  { %3096 = shalt.err (!%p3093_p11)
}
 0x95f   :  { %2138 = dma.vmem_to_hbm [thread:$0]  %s2136_s24, 64, %s3729_s6, [#allocation8]  }
 0x960   :  { %3103 = dma.done.wait [#allocation8], 64  }
 0x961   :  { %3104 = vsyncadd [#allocation8], 4294967232 }
 0x962   :  { %2142 = vsyncpa [#allocation7], 1 }
 0x963   :  { %2143 = vsyncpa [#allocation10], 1 }
 0x964   :  { %2144 = vsyncpa [#allocation13], 1 }
 0x965   :  { %2145 = vsyncpa [#allocation8], 1 }

</bundles_post_ra>
